<compile_context>
chip_gen: v6e
topology: v6e:2x2x1
jax: 0.10.0
libtpu: 0.0.40
codegen_flags: <defaults>
</compile_context>

<pallas_src>
import functools

import jax
import jax.numpy as jnp
from jax import lax
from jax.experimental import pallas as pl
from jax.experimental.pallas import tpu as pltpu

EPS = 1e-5
_VMEM_LIMIT = 32 * 1024 * 1024  # > v5e's 16 MiB default scoped cap, < v7x physical


# ----------------------------------------------------------------------- kernels
def _conv_body(a, pad_ref, t_ref, r_ref, y_ref, s_ref, *, H):
    """a: (H, W*Cin) activation value. Writes conv output + per-channel partial stats."""
    Kin = a.shape[1]
    M = y_ref.shape[1]
    # H-halo: zero only the two 1-row border strips, then write the interior once.
    pad_ref[0:1, :] = jnp.zeros((1, Kin), jnp.float32)
    pad_ref[H + 1:H + 2, :] = jnp.zeros((1, Kin), jnp.float32)
    pad_ref[1:H + 1, :] = a
    # 3x3 conv == 3 matmuls (one per row tap); the banded Toeplitz RHS folds the
    # 3 column taps, the Cin contraction and the W zero-padding into K.
    acc = jnp.zeros((H, M), jnp.float32)
    for ky in range(3):
        acc = acc + jnp.dot(pad_ref[ky:ky + H, :], t_ref[ky],
                            preferred_element_type=jnp.float32)
    y_ref[...] = acc
    # One-pass BN partials (sum, sum of squares) reduced to per-channel with a
    # 0/1 reduction matmul -> no lane->sublane relayout of the activation.
    cs = jnp.dot(acc, r_ref[...], preferred_element_type=jnp.float32)         # (H, Cout)
    css = jnp.dot(acc * acc, r_ref[...], preferred_element_type=jnp.float32)  # (H, Cout)
    s_ref[0:1, :] = jnp.sum(cs, axis=0, keepdims=True)
    s_ref[1:2, :] = jnp.sum(css, axis=0, keepdims=True)


def _conv_kernel(x_ref, t_ref, r_ref, y_ref, s_ref, pad_ref, *, H):
    # conv1: raw input, no preceding BN/ReLU.
    _conv_body(x_ref[...], pad_ref, t_ref, r_ref, y_ref, s_ref, H=H)


def _bn_relu_conv_kernel(x_ref, sc_ref, sh_ref, t_ref, r_ref, y_ref, s_ref,
                         pad_ref, *, H):
    # bn1 (folded into per-lane scale/shift) -> relu -> conv2.
    a = jnp.maximum(x_ref[...] * sc_ref[...] + sh_ref[...], 0.0)
    _conv_body(a, pad_ref, t_ref, r_ref, y_ref, s_ref, H=H)


def _bn_relu_pool_kernel(x_ref, sc_ref, sh_ref, se_ref, so_ref, xo_ref, po_ref, *, H):
    # bn2 -> relu -> xo ; 2x2 stride-2 maxpool -> po.
    Hh = H // 2
    a = jnp.maximum(x_ref[...] * sc_ref[...] + sh_ref[...], 0.0)
    xo_ref[...] = a
    # Row pairs via stride-2 sublane reads of the just-written output block.
    ev = xo_ref[pl.ds(0, Hh, stride=2), :]
    od = xo_ref[pl.ds(1, Hh, stride=2), :]
    rmax = jnp.maximum(ev, od)                                   # (Hh, W*Cout)
    # Column pairs via two exact 0/1 selection matmuls (keeps lanes dense).
    pe = jnp.dot(rmax, se_ref[...], preferred_element_type=jnp.float32)
    po_ref[...] = jnp.maximum(
        pe, jnp.dot(rmax, so_ref[...], preferred_element_type=jnp.float32))


# ------------------------------------------------------------------- host helpers
def _toeplitz_weights(w_oihw, W):
    """(Cout, Cin, 3, 3) torch conv weight -> (3, W*Cin, W*Cout) banded matmul weights.

    T[ky][xi*Cin+ci, xo*Cout+co] = w[co, ci, ky, xi-xo+1] (zero outside the band), so
    out_row(y) = sum_ky pad_row(y+ky-1) @ T[ky] implements the 3x3 conv with implicit
    zero padding along W.
    """
    Cout, Cin, _, _ = w_oihw.shape
    wk = jnp.transpose(w_oihw, (2, 3, 1, 0)).astype(jnp.float32)   # (ky, kx, Cin, Cout)
    ts = []
    for ky in range(3):
        t = jnp.zeros((W * Cin, W * Cout), jnp.float32)
        for kx in range(3):
            band = jnp.eye(W, W, k=1 - kx, dtype=jnp.float32)      # S[xi,xo]=1 iff xi=xo+kx-1
            t = t + jnp.kron(band, wk[ky, kx])
        ts.append(t)
    return jnp.stack(ts)


def _channel_reduce(W, C):
    """(W*C, C) 0/1 matrix summing the W copies of each channel lane group."""
    c = jnp.arange(W * C) % C
    return (c[:, None] == jnp.arange(C)[None, :]).astype(jnp.float32)


def _pool_select(W, C, parity):
    """(W*C, (W//2)*C) 0/1 matrix picking column x = 2*xh + parity of each channel."""
    src = jnp.arange(W * C)
    dst = jnp.arange((W // 2) * C)
    pick = ((src[:, None] // C == 2 * (dst[None, :] // C) + parity)
            & (src[:, None] % C == dst[None, :] % C))
    return pick.astype(jnp.float32)


def _bn_scale_shift(stats, gamma, beta, count):
    """Fold training-mode BN into per-channel scale/shift from (sum, sum_sq) partials."""
    tot = jnp.sum(stats, axis=0)                       # (2, Cout)
    mean = tot[0] / count
    var = tot[1] / count - mean * mean                 # biased variance (PyTorch norm)
    scale = gamma * lax.rsqrt(var + EPS)
    shift = beta - mean * scale
    return scale, shift


def _mosaic_params():
    return pltpu.CompilerParams(dimension_semantics=("parallel",),
                                vmem_limit_bytes=_VMEM_LIMIT)


def _full_spec(shape):
    return pl.BlockSpec(shape, lambda n, nd=len(shape): (0,) * nd)


def _batched_spec(shape):
    return pl.BlockSpec((None,) + shape,
                        lambda n, nd=len(shape): (n,) + (0,) * nd)


def _conv_call(x, t, r, sc_lane=None, sh_lane=None):
    N, H, Kin = x.shape
    M = t.shape[2]
    Cout = r.shape[1]
    if sc_lane is None:
        kern = functools.partial(_conv_kernel, H=H)
        args = (x, t, r)
        in_specs = [_batched_spec((H, Kin)), _full_spec(t.shape), _full_spec(r.shape)]
    else:
        kern = functools.partial(_bn_relu_conv_kernel, H=H)
        args = (x, sc_lane, sh_lane, t, r)
        in_specs = [_batched_spec((H, Kin)), _full_spec(sc_lane.shape),
                    _full_spec(sh_lane.shape), _full_spec(t.shape), _full_spec(r.shape)]
    return pl.pallas_call(
        kern,
        grid=(N,),
        in_specs=in_specs,
        out_specs=(_batched_spec((H, M)), _batched_spec((2, Cout))),
        out_shape=(jax.ShapeDtypeStruct((N, H, M), jnp.float32),
                   jax.ShapeDtypeStruct((N, 2, Cout), jnp.float32)),
        scratch_shapes=[pltpu.VMEM((H + 2, Kin), jnp.float32)],
        compiler_params=_mosaic_params(),
    )(*args)


def _bn_pool_call(y, sc_lane, sh_lane, sel_e, sel_o):
    N, H, M = y.shape
    Hh = H // 2
    Mp = sel_e.shape[1]
    return pl.pallas_call(
        functools.partial(_bn_relu_pool_kernel, H=H),
        grid=(N,),
        in_specs=[_batched_spec((H, M)), _full_spec(sc_lane.shape),
                  _full_spec(sh_lane.shape), _full_spec(sel_e.shape),
                  _full_spec(sel_o.shape)],
        out_specs=(_batched_spec((H, M)), _batched_spec((Hh, Mp))),
        out_shape=(jax.ShapeDtypeStruct((N, H, M), jnp.float32),
                   jax.ShapeDtypeStruct((N, Hh, Mp), jnp.float32)),
        compiler_params=_mosaic_params(),
    )(y, sc_lane, sh_lane, sel_e, sel_o)


def encoder_block_forward(x_nchw, params):
    """x_nchw: (N, Cin, H, W) float32 -> (x, p) in NCHW, matching the PyTorch module."""
    N, Cin, H, W = x_nchw.shape
    Cout = params["w1"].shape[0]
    assert H % 2 == 0 and W % 2 == 0, "2x2 maxpool needs even spatial dims"
    Hh, Wh = H // 2, W // 2
    count = N * H * W

    # TODO(synk): fuse the NCHW<->lane-dense layout change into the kernels.
    x = jnp.transpose(x_nchw, (0, 2, 3, 1)).astype(jnp.float32).reshape(N, H, W * Cin)

    t1 = _toeplitz_weights(params["w1"].astype(jnp.float32), W)   # (3, W*Cin,  W*Cout)
    t2 = _toeplitz_weights(params["w2"].astype(jnp.float32), W)   # (3, W*Cout, W*Cout)
    red = _channel_reduce(W, Cout)                                # (W*Cout, Cout)
    sel_e = _pool_select(W, Cout, 0)                              # (W*Cout, Wh*Cout)
    sel_o = _pool_select(W, Cout, 1)

    def lane(v):  # per-channel vector -> (1, W*Cout) lane layout (x*Cout + c)
        return jnp.tile(v.astype(jnp.float32), W).reshape(1, W * Cout)

    # conv1 (+ per-block BN1 partial stats)
    y1, s1 = _conv_call(x, t1, red)
    sc1, sh1 = _bn_scale_shift(s1, params["g1"].astype(jnp.float32),
                               params["beta1"].astype(jnp.float32), count)
    # bn1 -> relu -> conv2 (+ per-block BN2 partial stats)
    y2, s2 = _conv_call(y1, t2, red, lane(sc1), lane(sh1))
    sc2, sh2 = _bn_scale_shift(s2, params["g2"].astype(jnp.float32),
                               params["beta2"].astype(jnp.float32), count)
    # bn2 -> relu -> xo ; maxpool -> po
    xo2d, po2d = _bn_pool_call(y2, lane(sc2), lane(sh2), sel_e, sel_o)

    xo = jnp.transpose(xo2d.reshape(N, H, W, Cout), (0, 3, 1, 2))
    po = jnp.transpose(po2d.reshape(N, Hh, Wh, Cout), (0, 3, 1, 2))
    return xo, po


def ref_forward(x, p):
    """Pure-JAX NCHW reference mirroring the PyTorch module (training-mode BN)."""
    def conv(x, w, b):
        y = lax.conv_general_dilated(x, w, (1, 1), ((1, 1), (1, 1)),
                                     dimension_numbers=("NCHW", "OIHW", "NCHW"),
                                     precision=lax.Precision.HIGHEST)
        return y + b[None, :, None, None]

    def bn_relu(y, g, be):
        mean = y.mean(axis=(0, 2, 3), keepdims=True)
        var = ((y - mean) ** 2).mean(axis=(0, 2, 3), keepdims=True)
        yh = (y - mean) / jnp.sqrt(var + EPS)
        yh = yh * g[None, :, None, None] + be[None, :, None, None]
        return jnp.maximum(yh, 0.0)

    y = bn_relu(conv(x, p["w1"], p["b1"]), p["g1"], p["beta1"])
    y = bn_relu(conv(y, p["w2"], p["b2"]), p["g2"], p["beta2"])
    pooled = lax.reduce_window(y, -jnp.inf, lax.max,
                               (1, 1, 2, 2), (1, 1, 2, 2), "VALID")
    return y, pooled


if __name__ == "__main__":
    import numpy as np

    key = jax.random.PRNGKey(0)
    ks = jax.random.split(key, 9)

    in_c, out_c = 4, 8
    N, H, W = 2, 16, 16

    x = jax.random.normal(ks[0], (N, in_c, H, W), jnp.float32)
    params = {
        "w1": 0.1 * jax.random.normal(ks[1], (out_c, in_c, 3, 3), jnp.float32),
        "b1": 0.1 * jax.random.normal(ks[2], (out_c,), jnp.float32),
        "g1": 1.0 + 0.1 * jax.random.normal(ks[3], (out_c,), jnp.float32),
        "beta1": 0.1 * jax.random.normal(ks[4], (out_c,), jnp.float32),
        "w2": 0.1 * jax.random.normal(ks[5], (out_c, out_c, 3, 3), jnp.float32),
        "b2": 0.1 * jax.random.normal(ks[6], (out_c,), jnp.float32),
        "g2": 1.0 + 0.1 * jax.random.normal(ks[7], (out_c,), jnp.float32),
        "beta2": 0.1 * jax.random.normal(ks[8], (out_c,), jnp.float32),
    }

    xo, po = jax.jit(encoder_block_forward)(x, params)
    jax.block_until_ready((xo, po))

    assert xo.shape == (N, out_c, H, W)
    assert po.shape == (N, out_c, H // 2, W // 2)

    xr, pr = ref_forward(x, params)
    np.testing.assert_allclose(np.asarray(xo), np.asarray(xr), atol=2e-2, rtol=2e-2)
    np.testing.assert_allclose(np.asarray(po), np.asarray(pr), atol=2e-2, rtol=2e-2)

    print("KERNEL_OK")
</pallas_src>

<mosaic_0001>
module attributes {stable_mosaic.version = 11 : i64} {
  func.func @_conv_kernel(%arg0: i32, %arg1: memref<1x16x64xf32, #tpu.memory_space<vmem>>, %arg2: memref<3x64x128xf32, #tpu.memory_space<vmem>>, %arg3: memref<128x8xf32, #tpu.memory_space<vmem>>, %arg4: memref<1x16x128xf32, #tpu.memory_space<vmem>>, %arg5: memref<1x2x8xf32, #tpu.memory_space<vmem>>, %arg6: memref<18x64xf32, #tpu.memory_space<vmem>>) attributes {dimension_semantics = [#tpu.dimension_semantics<parallel>], iteration_bounds = array<i64: 2>, scalar_prefetch = 0 : i64, scratch_operands = 1 : i64, tpu.core_type = #tpu.core_type<tc>, window_params = [{transform_indices = @transform_0, window_bounds = array<i64: 1, 16, 64>}, {pipeline_mode = #tpu.pipeline_mode<synchronous>, transform_indices = @transform_1, window_bounds = array<i64: 3, 64, 128>}, {pipeline_mode = #tpu.pipeline_mode<synchronous>, transform_indices = @transform_2, window_bounds = array<i64: 128, 8>}, {transform_indices = @transform_3, window_bounds = array<i64: 1, 16, 128>}, {transform_indices = @transform_4, window_bounds = array<i64: 1, 2, 8>}]} {
    %c0 = arith.constant 0 : index
    %c0_0 = arith.constant 0 : index
    %c0_1 = arith.constant 0 : index
    %0 = vector.load %arg1[%c0, %c0_0, %c0_1] : memref<1x16x64xf32, #tpu.memory_space<vmem>>, vector<1x16x64xf32>
    %1 = vector.shape_cast %0 : vector<1x16x64xf32> to vector<16x64xf32>
    %cst = arith.constant 0.000000e+00 : f32
    %2 = vector.broadcast %cst : f32 to vector<1x64xf32>
    %c0_2 = arith.constant 0 : index
    %c0_3 = arith.constant 0 : index
    %3 = vector.load %arg6[%c0_2, %c0_3] : memref<18x64xf32, #tpu.memory_space<vmem>>, vector<1x64xf32>
    tpu.vector_store %arg6[%c0_2, %c0_3], %2 {strides = array<i32>} : memref<18x64xf32, #tpu.memory_space<vmem>>, vector<1x64xf32>,
    %cst_4 = arith.constant 0.000000e+00 : f32
    %4 = vector.broadcast %cst_4 : f32 to vector<1x64xf32>
    %c17 = arith.constant 17 : index
    %c0_5 = arith.constant 0 : index
    %5 = vector.load %arg6[%c17, %c0_5] : memref<18x64xf32, #tpu.memory_space<vmem>>, vector<1x64xf32>
    tpu.vector_store %arg6[%c17, %c0_5], %4 {strides = array<i32>} : memref<18x64xf32, #tpu.memory_space<vmem>>, vector<1x64xf32>,
    %c1 = arith.constant 1 : index
    %c0_6 = arith.constant 0 : index
    %6 = vector.load %arg6[%c1, %c0_6] : memref<18x64xf32, #tpu.memory_space<vmem>>, vector<16x64xf32>
    tpu.vector_store %arg6[%c1, %c0_6], %1 {strides = array<i32>} : memref<18x64xf32, #tpu.memory_space<vmem>>, vector<16x64xf32>,
    %cst_7 = arith.constant 0.000000e+00 : f32
    %7 = vector.broadcast %cst_7 : f32 to vector<16x128xf32>
    %c0_8 = arith.constant 0 : index
    %c0_9 = arith.constant 0 : index
    %8 = vector.load %arg6[%c0_8, %c0_9] : memref<18x64xf32, #tpu.memory_space<vmem>>, vector<16x64xf32>
    %c0_10 = arith.constant 0 : index
    %c0_11 = arith.constant 0 : index
    %c0_12 = arith.constant 0 : index
    %9 = vector.load %arg2[%c0_10, %c0_11, %c0_12] : memref<3x64x128xf32, #tpu.memory_space<vmem>>, vector<1x64x128xf32>
    %10 = vector.shape_cast %9 : vector<1x64x128xf32> to vector<64x128xf32>
    %cst_13 = arith.constant dense<0.000000e+00> : vector<16x128xf32>
    %11 = tpu.matmul %8, %10, %cst_13 {dimension_numbers = #tpu.dot_dimension_numbers<[1], [0], [0], [1], [0, 0, 1, 1], [], []>} : vector<16x64xf32>, vector<64x128xf32>, vector<16x128xf32> -> vector<16x128xf32>
    %12 = arith.addf %7, %11 : vector<16x128xf32>
    %c1_14 = arith.constant 1 : index
    %c0_15 = arith.constant 0 : index
    %13 = vector.load %arg6[%c1_14, %c0_15] : memref<18x64xf32, #tpu.memory_space<vmem>>, vector<16x64xf32>
    %c1_16 = arith.constant 1 : index
    %c0_17 = arith.constant 0 : index
    %c0_18 = arith.constant 0 : index
    %14 = vector.load %arg2[%c1_16, %c0_17, %c0_18] : memref<3x64x128xf32, #tpu.memory_space<vmem>>, vector<1x64x128xf32>
    %15 = vector.shape_cast %14 : vector<1x64x128xf32> to vector<64x128xf32>
    %cst_19 = arith.constant dense<0.000000e+00> : vector<16x128xf32>
    %16 = tpu.matmul %13, %15, %cst_19 {dimension_numbers = #tpu.dot_dimension_numbers<[1], [0], [0], [1], [0, 0, 1, 1], [], []>} : vector<16x64xf32>, vector<64x128xf32>, vector<16x128xf32> -> vector<16x128xf32>
    %17 = arith.addf %12, %16 : vector<16x128xf32>
    %c2 = arith.constant 2 : index
    %c0_20 = arith.constant 0 : index
    %18 = vector.load %arg6[%c2, %c0_20] : memref<18x64xf32, #tpu.memory_space<vmem>>, vector<16x64xf32>
    %c2_21 = arith.constant 2 : index
    %c0_22 = arith.constant 0 : index
    %c0_23 = arith.constant 0 : index
    %19 = vector.load %arg2[%c2_21, %c0_22, %c0_23] : memref<3x64x128xf32, #tpu.memory_space<vmem>>, vector<1x64x128xf32>
    %20 = vector.shape_cast %19 : vector<1x64x128xf32> to vector<64x128xf32>
    %cst_24 = arith.constant dense<0.000000e+00> : vector<16x128xf32>
    %21 = tpu.matmul %18, %20, %cst_24 {dimension_numbers = #tpu.dot_dimension_numbers<[1], [0], [0], [1], [0, 0, 1, 1], [], []>} : vector<16x64xf32>, vector<64x128xf32>, vector<16x128xf32> -> vector<16x128xf32>
    %22 = arith.addf %17, %21 : vector<16x128xf32>
    %c0_25 = arith.constant 0 : index
    %c0_26 = arith.constant 0 : index
    %c0_27 = arith.constant 0 : index
    %23 = vector.load %arg4[%c0_25, %c0_26, %c0_27] : memref<1x16x128xf32, #tpu.memory_space<vmem>>, vector<1x16x128xf32>
    %24 = vector.shape_cast %23 : vector<1x16x128xf32> to vector<16x128xf32>
    %25 = vector.shape_cast %22 : vector<16x128xf32> to vector<1x16x128xf32>
    tpu.vector_store %arg4[%c0_25, %c0_26, %c0_27], %25 {strides = array<i32>} : memref<1x16x128xf32, #tpu.memory_space<vmem>>, vector<1x16x128xf32>,
    %c0_28 = arith.constant 0 : index
    %c0_29 = arith.constant 0 : index
    %26 = vector.load %arg3[%c0_28, %c0_29] : memref<128x8xf32, #tpu.memory_space<vmem>>, vector<128x8xf32>
    %cst_30 = arith.constant dense<0.000000e+00> : vector<16x8xf32>
    %27 = tpu.matmul %22, %26, %cst_30 {dimension_numbers = #tpu.dot_dimension_numbers<[1], [0], [0], [1], [0, 0, 1, 1], [], []>} : vector<16x128xf32>, vector<128x8xf32>, vector<16x8xf32> -> vector<16x8xf32>
    %28 = arith.mulf %22, %22 : vector<16x128xf32>
    %c0_31 = arith.constant 0 : index
    %c0_32 = arith.constant 0 : index
    %29 = vector.load %arg3[%c0_31, %c0_32] : memref<128x8xf32, #tpu.memory_space<vmem>>, vector<128x8xf32>
    %cst_33 = arith.constant dense<0.000000e+00> : vector<16x8xf32>
    %30 = tpu.matmul %28, %29, %cst_33 {dimension_numbers = #tpu.dot_dimension_numbers<[1], [0], [0], [1], [0, 0, 1, 1], [], []>} : vector<16x128xf32>, vector<128x8xf32>, vector<16x8xf32> -> vector<16x8xf32>
    %cst_34 = arith.constant dense<0.000000e+00> : vector<8xf32>
    %31 = vector.multi_reduction <add>, %27, %cst_34 [0] : vector<16x8xf32> to vector<8xf32>
    %32 = vector.shape_cast %31 : vector<8xf32> to vector<1x8xf32>
    %c0_35 = arith.constant 0 : index
    %c0_36 = arith.constant 0 : index
    %c0_37 = arith.constant 0 : index
    %33 = vector.load %arg5[%c0_35, %c0_36, %c0_37] : memref<1x2x8xf32, #tpu.memory_space<vmem>>, vector<1x1x8xf32>
    %34 = vector.shape_cast %33 : vector<1x1x8xf32> to vector<1x8xf32>
    %35 = vector.shape_cast %32 : vector<1x8xf32> to vector<1x1x8xf32>
    tpu.vector_store %arg5[%c0_35, %c0_36, %c0_37], %35 {strides = array<i32>} : memref<1x2x8xf32, #tpu.memory_space<vmem>>, vector<1x1x8xf32>,
    %cst_38 = arith.constant dense<0.000000e+00> : vector<8xf32>
    %36 = vector.multi_reduction <add>, %30, %cst_38 [0] : vector<16x8xf32> to vector<8xf32>
    %37 = vector.shape_cast %36 : vector<8xf32> to vector<1x8xf32>
    %c0_39 = arith.constant 0 : index
    %c1_40 = arith.constant 1 : index
    %c0_41 = arith.constant 0 : index
    %38 = vector.load %arg5[%c0_39, %c1_40, %c0_41] : memref<1x2x8xf32, #tpu.memory_space<vmem>>, vector<1x1x8xf32>
    %39 = vector.shape_cast %38 : vector<1x1x8xf32> to vector<1x8xf32>
    %40 = vector.shape_cast %37 : vector<1x8xf32> to vector<1x1x8xf32>
    tpu.vector_store %arg5[%c0_39, %c1_40, %c0_41], %40 {strides = array<i32>} : memref<1x2x8xf32, #tpu.memory_space<vmem>>, vector<1x1x8xf32>,
    return
  }
  func.func @transform_0(%arg0: i32) -> (i32, i32, i32) {
    %c0_i32 = arith.constant 0 : i32
    %c0_i32_0 = arith.constant 0 : i32
    %c0_i32_1 = arith.constant 0 : i32
    return %arg0, %c0_i32, %c0_i32_0 : i32, i32, i32
  }
  func.func @transform_1(%arg0: i32) -> (i32, i32, i32) {
    %c0_i32 = arith.constant 0 : i32
    %c0_i32_0 = arith.constant 0 : i32
    %c0_i32_1 = arith.constant 0 : i32
    %c0_i32_2 = arith.constant 0 : i32
    return %c0_i32, %c0_i32_0, %c0_i32_1 : i32, i32, i32
  }
  func.func @transform_2(%arg0: i32) -> (i32, i32) {
    %c0_i32 = arith.constant 0 : i32
    %c0_i32_0 = arith.constant 0 : i32
    %c0_i32_1 = arith.constant 0 : i32
    return %c0_i32, %c0_i32_0 : i32, i32
  }
  func.func @transform_3(%arg0: i32) -> (i32, i32, i32) {
    %c0_i32 = arith.constant 0 : i32
    %c0_i32_0 = arith.constant 0 : i32
    %c0_i32_1 = arith.constant 0 : i32
    return %arg0, %c0_i32, %c0_i32_0 : i32, i32, i32
  }
  func.func @transform_4(%arg0: i32) -> (i32, i32, i32) {
    %c0_i32 = arith.constant 0 : i32
    %c0_i32_0 = arith.constant 0 : i32
    %c0_i32_1 = arith.constant 0 : i32
    return %arg0, %c0_i32, %c0_i32_0 : i32, i32, i32
  }
}

module attributes {stable_mosaic.version = 11 : i64} {
  func.func @_bn_relu_conv_kernel(%arg0: i32, %arg1: memref<1x16x128xf32, #tpu.memory_space<vmem>>, %arg2: memref<1x128xf32, #tpu.memory_space<vmem>>, %arg3: memref<1x128xf32, #tpu.memory_space<vmem>>, %arg4: memref<3x128x128xf32, #tpu.memory_space<vmem>>, %arg5: memref<128x8xf32, #tpu.memory_space<vmem>>, %arg6: memref<1x16x128xf32, #tpu.memory_space<vmem>>, %arg7: memref<1x2x8xf32, #tpu.memory_space<vmem>>, %arg8: memref<18x128xf32, #tpu.memory_space<vmem>>) attributes {dimension_semantics = [#tpu.dimension_semantics<parallel>], iteration_bounds = array<i64: 2>, scalar_prefetch = 0 : i64, scratch_operands = 1 : i64, tpu.core_type = #tpu.core_type<tc>, window_params = [{transform_indices = @transform_0, window_bounds = array<i64: 1, 16, 128>}, {pipeline_mode = #tpu.pipeline_mode<synchronous>, transform_indices = @transform_1, window_bounds = array<i64: 1, 128>}, {pipeline_mode = #tpu.pipeline_mode<synchronous>, transform_indices = @transform_2, window_bounds = array<i64: 1, 128>}, {pipeline_mode = #tpu.pipeline_mode<synchronous>, transform_indices = @transform_3, window_bounds = array<i64: 3, 128, 128>}, {pipeline_mode = #tpu.pipeline_mode<synchronous>, transform_indices = @transform_4, window_bounds = array<i64: 128, 8>}, {transform_indices = @transform_5, window_bounds = array<i64: 1, 16, 128>}, {transform_indices = @transform_6, window_bounds = array<i64: 1, 2, 8>}]} {
    %c0 = arith.constant 0 : index
    %c0_0 = arith.constant 0 : index
    %c0_1 = arith.constant 0 : index
    %0 = vector.load %arg1[%c0, %c0_0, %c0_1] : memref<1x16x128xf32, #tpu.memory_space<vmem>>, vector<1x16x128xf32>
    %1 = vector.shape_cast %0 : vector<1x16x128xf32> to vector<16x128xf32>
    %c0_2 = arith.constant 0 : index
    %c0_3 = arith.constant 0 : index
    %2 = vector.load %arg2[%c0_2, %c0_3] : memref<1x128xf32, #tpu.memory_space<vmem>>, vector<1x128xf32>
    %3 = vector.broadcast %2 : vector<1x128xf32> to vector<16x128xf32>
    %4 = arith.mulf %1, %3 : vector<16x128xf32>
    %c0_4 = arith.constant 0 : index
    %c0_5 = arith.constant 0 : index
    %5 = vector.load %arg3[%c0_4, %c0_5] : memref<1x128xf32, #tpu.memory_space<vmem>>, vector<1x128xf32>
    %6 = vector.broadcast %5 : vector<1x128xf32> to vector<16x128xf32>
    %7 = arith.addf %4, %6 : vector<16x128xf32>
    %cst = arith.constant 0.000000e+00 : f32
    %8 = vector.broadcast %cst : f32 to vector<16x128xf32>
    %9 = arith.maximumf %7, %8 : vector<16x128xf32>
    %cst_6 = arith.constant 0.000000e+00 : f32
    %10 = vector.broadcast %cst_6 : f32 to vector<1x128xf32>
    %c0_7 = arith.constant 0 : index
    %c0_8 = arith.constant 0 : index
    %11 = vector.load %arg8[%c0_7, %c0_8] : memref<18x128xf32, #tpu.memory_space<vmem>>, vector<1x128xf32>
    tpu.vector_store %arg8[%c0_7, %c0_8], %10 {strides = array<i32>} : memref<18x128xf32, #tpu.memory_space<vmem>>, vector<1x128xf32>,
    %cst_9 = arith.constant 0.000000e+00 : f32
    %12 = vector.broadcast %cst_9 : f32 to vector<1x128xf32>
    %c17 = arith.constant 17 : index
    %c0_10 = arith.constant 0 : index
    %13 = vector.load %arg8[%c17, %c0_10] : memref<18x128xf32, #tpu.memory_space<vmem>>, vector<1x128xf32>
    tpu.vector_store %arg8[%c17, %c0_10], %12 {strides = array<i32>} : memref<18x128xf32, #tpu.memory_space<vmem>>, vector<1x128xf32>,
    %c1 = arith.constant 1 : index
    %c0_11 = arith.constant 0 : index
    %14 = vector.load %arg8[%c1, %c0_11] : memref<18x128xf32, #tpu.memory_space<vmem>>, vector<16x128xf32>
    tpu.vector_store %arg8[%c1, %c0_11], %9 {strides = array<i32>} : memref<18x128xf32, #tpu.memory_space<vmem>>, vector<16x128xf32>,
    %cst_12 = arith.constant 0.000000e+00 : f32
    %15 = vector.broadcast %cst_12 : f32 to vector<16x128xf32>
    %c0_13 = arith.constant 0 : index
    %c0_14 = arith.constant 0 : index
    %16 = vector.load %arg8[%c0_13, %c0_14] : memref<18x128xf32, #tpu.memory_space<vmem>>, vector<16x128xf32>
    %c0_15 = arith.constant 0 : index
    %c0_16 = arith.constant 0 : index
    %c0_17 = arith.constant 0 : index
    %17 = vector.load %arg4[%c0_15, %c0_16, %c0_17] : memref<3x128x128xf32, #tpu.memory_space<vmem>>, vector<1x128x128xf32>
    %18 = vector.shape_cast %17 : vector<1x128x128xf32> to vector<128x128xf32>
    %cst_18 = arith.constant dense<0.000000e+00> : vector<16x128xf32>
    %19 = tpu.matmul %16, %18, %cst_18 {dimension_numbers = #tpu.dot_dimension_numbers<[1], [0], [0], [1], [0, 0, 1, 1], [], []>} : vector<16x128xf32>, vector<128x128xf32>, vector<16x128xf32> -> vector<16x128xf32>
    %20 = arith.addf %15, %19 : vector<16x128xf32>
    %c1_19 = arith.constant 1 : index
    %c0_20 = arith.constant 0 : index
    %21 = vector.load %arg8[%c1_19, %c0_20] : memref<18x128xf32, #tpu.memory_space<vmem>>, vector<16x128xf32>
    %c1_21 = arith.constant 1 : index
    %c0_22 = arith.constant 0 : index
    %c0_23 = arith.constant 0 : index
    %22 = vector.load %arg4[%c1_21, %c0_22, %c0_23] : memref<3x128x128xf32, #tpu.memory_space<vmem>>, vector<1x128x128xf32>
    %23 = vector.shape_cast %22 : vector<1x128x128xf32> to vector<128x128xf32>
    %cst_24 = arith.constant dense<0.000000e+00> : vector<16x128xf32>
    %24 = tpu.matmul %21, %23, %cst_24 {dimension_numbers = #tpu.dot_dimension_numbers<[1], [0], [0], [1], [0, 0, 1, 1], [], []>} : vector<16x128xf32>, vector<128x128xf32>, vector<16x128xf32> -> vector<16x128xf32>
    %25 = arith.addf %20, %24 : vector<16x128xf32>
    %c2 = arith.constant 2 : index
    %c0_25 = arith.constant 0 : index
    %26 = vector.load %arg8[%c2, %c0_25] : memref<18x128xf32, #tpu.memory_space<vmem>>, vector<16x128xf32>
    %c2_26 = arith.constant 2 : index
    %c0_27 = arith.constant 0 : index
    %c0_28 = arith.constant 0 : index
    %27 = vector.load %arg4[%c2_26, %c0_27, %c0_28] : memref<3x128x128xf32, #tpu.memory_space<vmem>>, vector<1x128x128xf32>
    %28 = vector.shape_cast %27 : vector<1x128x128xf32> to vector<128x128xf32>
    %cst_29 = arith.constant dense<0.000000e+00> : vector<16x128xf32>
    %29 = tpu.matmul %26, %28, %cst_29 {dimension_numbers = #tpu.dot_dimension_numbers<[1], [0], [0], [1], [0, 0, 1, 1], [], []>} : vector<16x128xf32>, vector<128x128xf32>, vector<16x128xf32> -> vector<16x128xf32>
    %30 = arith.addf %25, %29 : vector<16x128xf32>
    %c0_30 = arith.constant 0 : index
    %c0_31 = arith.constant 0 : index
    %c0_32 = arith.constant 0 : index
    %31 = vector.load %arg6[%c0_30, %c0_31, %c0_32] : memref<1x16x128xf32, #tpu.memory_space<vmem>>, vector<1x16x128xf32>
    %32 = vector.shape_cast %31 : vector<1x16x128xf32> to vector<16x128xf32>
    %33 = vector.shape_cast %30 : vector<16x128xf32> to vector<1x16x128xf32>
    tpu.vector_store %arg6[%c0_30, %c0_31, %c0_32], %33 {strides = array<i32>} : memref<1x16x128xf32, #tpu.memory_space<vmem>>, vector<1x16x128xf32>,
    %c0_33 = arith.constant 0 : index
    %c0_34 = arith.constant 0 : index
    %34 = vector.load %arg5[%c0_33, %c0_34] : memref<128x8xf32, #tpu.memory_space<vmem>>, vector<128x8xf32>
    %cst_35 = arith.constant dense<0.000000e+00> : vector<16x8xf32>
    %35 = tpu.matmul %30, %34, %cst_35 {dimension_numbers = #tpu.dot_dimension_numbers<[1], [0], [0], [1], [0, 0, 1, 1], [], []>} : vector<16x128xf32>, vector<128x8xf32>, vector<16x8xf32> -> vector<16x8xf32>
    %36 = arith.mulf %30, %30 : vector<16x128xf32>
    %c0_36 = arith.constant 0 : index
    %c0_37 = arith.constant 0 : index
    %37 = vector.load %arg5[%c0_36, %c0_37] : memref<128x8xf32, #tpu.memory_space<vmem>>, vector<128x8xf32>
    %cst_38 = arith.constant dense<0.000000e+00> : vector<16x8xf32>
    %38 = tpu.matmul %36, %37, %cst_38 {dimension_numbers = #tpu.dot_dimension_numbers<[1], [0], [0], [1], [0, 0, 1, 1], [], []>} : vector<16x128xf32>, vector<128x8xf32>, vector<16x8xf32> -> vector<16x8xf32>
    %cst_39 = arith.constant dense<0.000000e+00> : vector<8xf32>
    %39 = vector.multi_reduction <add>, %35, %cst_39 [0] : vector<16x8xf32> to vector<8xf32>
    %40 = vector.shape_cast %39 : vector<8xf32> to vector<1x8xf32>
    %c0_40 = arith.constant 0 : index
    %c0_41 = arith.constant 0 : index
    %c0_42 = arith.constant 0 : index
    %41 = vector.load %arg7[%c0_40, %c0_41, %c0_42] : memref<1x2x8xf32, #tpu.memory_space<vmem>>, vector<1x1x8xf32>
    %42 = vector.shape_cast %41 : vector<1x1x8xf32> to vector<1x8xf32>
    %43 = vector.shape_cast %40 : vector<1x8xf32> to vector<1x1x8xf32>
    tpu.vector_store %arg7[%c0_40, %c0_41, %c0_42], %43 {strides = array<i32>} : memref<1x2x8xf32, #tpu.memory_space<vmem>>, vector<1x1x8xf32>,
    %cst_43 = arith.constant dense<0.000000e+00> : vector<8xf32>
    %44 = vector.multi_reduction <add>, %38, %cst_43 [0] : vector<16x8xf32> to vector<8xf32>
    %45 = vector.shape_cast %44 : vector<8xf32> to vector<1x8xf32>
    %c0_44 = arith.constant 0 : index
    %c1_45 = arith.constant 1 : index
    %c0_46 = arith.constant 0 : index
    %46 = vector.load %arg7[%c0_44, %c1_45, %c0_46] : memref<1x2x8xf32, #tpu.memory_space<vmem>>, vector<1x1x8xf32>
    %47 = vector.shape_cast %46 : vector<1x1x8xf32> to vector<1x8xf32>
    %48 = vector.shape_cast %45 : vector<1x8xf32> to vector<1x1x8xf32>
    tpu.vector_store %arg7[%c0_44, %c1_45, %c0_46], %48 {strides = array<i32>} : memref<1x2x8xf32, #tpu.memory_space<vmem>>, vector<1x1x8xf32>,
    return
  }
  func.func @transform_0(%arg0: i32) -> (i32, i32, i32) {
    %c0_i32 = arith.constant 0 : i32
    %c0_i32_0 = arith.constant 0 : i32
    %c0_i32_1 = arith.constant 0 : i32
    return %arg0, %c0_i32, %c0_i32_0 : i32, i32, i32
  }
  func.func @transform_1(%arg0: i32) -> (i32, i32) {
    %c0_i32 = arith.constant 0 : i32
    %c0_i32_0 = arith.constant 0 : i32
    %c0_i32_1 = arith.constant 0 : i32
    return %c0_i32, %c0_i32_0 : i32, i32
  }
  func.func @transform_2(%arg0: i32) -> (i32, i32) {
    %c0_i32 = arith.constant 0 : i32
    %c0_i32_0 = arith.constant 0 : i32
    %c0_i32_1 = arith.constant 0 : i32
    return %c0_i32, %c0_i32_0 : i32, i32
  }
  func.func @transform_3(%arg0: i32) -> (i32, i32, i32) {
    %c0_i32 = arith.constant 0 : i32
    %c0_i32_0 = arith.constant 0 : i32
    %c0_i32_1 = arith.constant 0 : i32
    %c0_i32_2 = arith.constant 0 : i32
    return %c0_i32, %c0_i32_0, %c0_i32_1 : i32, i32, i32
  }
  func.func @transform_4(%arg0: i32) -> (i32, i32) {
    %c0_i32 = arith.constant 0 : i32
    %c0_i32_0 = arith.constant 0 : i32
    %c0_i32_1 = arith.constant 0 : i32
    return %c0_i32, %c0_i32_0 : i32, i32
  }
  func.func @transform_5(%arg0: i32) -> (i32, i32, i32) {
    %c0_i32 = arith.constant 0 : i32
    %c0_i32_0 = arith.constant 0 : i32
    %c0_i32_1 = arith.constant 0 : i32
    return %arg0, %c0_i32, %c0_i32_0 : i32, i32, i32
  }
  func.func @transform_6(%arg0: i32) -> (i32, i32, i32) {
    %c0_i32 = arith.constant 0 : i32
    %c0_i32_0 = arith.constant 0 : i32
    %c0_i32_1 = arith.constant 0 : i32
    return %arg0, %c0_i32, %c0_i32_0 : i32, i32, i32
  }
}

module attributes {stable_mosaic.version = 11 : i64} {
  func.func @_bn_relu_pool_kernel(%arg0: i32, %arg1: memref<1x16x128xf32, #tpu.memory_space<vmem>>, %arg2: memref<1x128xf32, #tpu.memory_space<vmem>>, %arg3: memref<1x128xf32, #tpu.memory_space<vmem>>, %arg4: memref<128x64xf32, #tpu.memory_space<vmem>>, %arg5: memref<128x64xf32, #tpu.memory_space<vmem>>, %arg6: memref<1x16x128xf32, #tpu.memory_space<vmem>>, %arg7: memref<1x8x64xf32, #tpu.memory_space<vmem>>) attributes {dimension_semantics = [#tpu.dimension_semantics<parallel>], iteration_bounds = array<i64: 2>, scalar_prefetch = 0 : i64, scratch_operands = 0 : i64, tpu.core_type = #tpu.core_type<tc>, window_params = [{transform_indices = @transform_0, window_bounds = array<i64: 1, 16, 128>}, {pipeline_mode = #tpu.pipeline_mode<synchronous>, transform_indices = @transform_1, window_bounds = array<i64: 1, 128>}, {pipeline_mode = #tpu.pipeline_mode<synchronous>, transform_indices = @transform_2, window_bounds = array<i64: 1, 128>}, {pipeline_mode = #tpu.pipeline_mode<synchronous>, transform_indices = @transform_3, window_bounds = array<i64: 128, 64>}, {pipeline_mode = #tpu.pipeline_mode<synchronous>, transform_indices = @transform_4, window_bounds = array<i64: 128, 64>}, {transform_indices = @transform_5, window_bounds = array<i64: 1, 16, 128>}, {transform_indices = @transform_6, window_bounds = array<i64: 1, 8, 64>}]} {
    %c0 = arith.constant 0 : index
    %c0_0 = arith.constant 0 : index
    %c0_1 = arith.constant 0 : index
    %0 = vector.load %arg1[%c0, %c0_0, %c0_1] : memref<1x16x128xf32, #tpu.memory_space<vmem>>, vector<1x16x128xf32>
    %1 = vector.shape_cast %0 : vector<1x16x128xf32> to vector<16x128xf32>
    %c0_2 = arith.constant 0 : index
    %c0_3 = arith.constant 0 : index
    %2 = vector.load %arg2[%c0_2, %c0_3] : memref<1x128xf32, #tpu.memory_space<vmem>>, vector<1x128xf32>
    %3 = vector.broadcast %2 : vector<1x128xf32> to vector<16x128xf32>
    %4 = arith.mulf %1, %3 : vector<16x128xf32>
    %c0_4 = arith.constant 0 : index
    %c0_5 = arith.constant 0 : index
    %5 = vector.load %arg3[%c0_4, %c0_5] : memref<1x128xf32, #tpu.memory_space<vmem>>, vector<1x128xf32>
    %6 = vector.broadcast %5 : vector<1x128xf32> to vector<16x128xf32>
    %7 = arith.addf %4, %6 : vector<16x128xf32>
    %cst = arith.constant 0.000000e+00 : f32
    %8 = vector.broadcast %cst : f32 to vector<16x128xf32>
    %9 = arith.maximumf %7, %8 : vector<16x128xf32>
    %c0_6 = arith.constant 0 : index
    %c0_7 = arith.constant 0 : index
    %c0_8 = arith.constant 0 : index
    %10 = vector.load %arg6[%c0_6, %c0_7, %c0_8] : memref<1x16x128xf32, #tpu.memory_space<vmem>>, vector<1x16x128xf32>
    %11 = vector.shape_cast %10 : vector<1x16x128xf32> to vector<16x128xf32>
    %12 = vector.shape_cast %9 : vector<16x128xf32> to vector<1x16x128xf32>
    tpu.vector_store %arg6[%c0_6, %c0_7, %c0_8], %12 {strides = array<i32>} : memref<1x16x128xf32, #tpu.memory_space<vmem>>, vector<1x16x128xf32>,
    %c0_9 = arith.constant 0 : index
    %c0_10 = arith.constant 0 : index
    %c0_11 = arith.constant 0 : index
    %13 = tpu.strided_load %arg6[%c0_9, %c0_10, %c0_11] {strides = array<i32: 1, 2, 1>} : memref<1x16x128xf32, #tpu.memory_space<vmem>>, vector<1x8x128xf32>
    %14 = vector.shape_cast %13 : vector<1x8x128xf32> to vector<8x128xf32>
    %c0_12 = arith.constant 0 : index
    %c1 = arith.constant 1 : index
    %c0_13 = arith.constant 0 : index
    %15 = tpu.strided_load %arg6[%c0_12, %c1, %c0_13] {strides = array<i32: 1, 2, 1>} : memref<1x16x128xf32, #tpu.memory_space<vmem>>, vector<1x8x128xf32>
    %16 = vector.shape_cast %15 : vector<1x8x128xf32> to vector<8x128xf32>
    %17 = arith.maximumf %14, %16 : vector<8x128xf32>
    %c0_14 = arith.constant 0 : index
    %c0_15 = arith.constant 0 : index
    %18 = vector.load %arg4[%c0_14, %c0_15] : memref<128x64xf32, #tpu.memory_space<vmem>>, vector<128x64xf32>
    %cst_16 = arith.constant dense<0.000000e+00> : vector<8x64xf32>
    %19 = tpu.matmul %17, %18, %cst_16 {dimension_numbers = #tpu.dot_dimension_numbers<[1], [0], [0], [1], [0, 0, 1, 1], [], []>} : vector<8x128xf32>, vector<128x64xf32>, vector<8x64xf32> -> vector<8x64xf32>
    %c0_17 = arith.constant 0 : index
    %c0_18 = arith.constant 0 : index
    %20 = vector.load %arg5[%c0_17, %c0_18] : memref<128x64xf32, #tpu.memory_space<vmem>>, vector<128x64xf32>
    %cst_19 = arith.constant dense<0.000000e+00> : vector<8x64xf32>
    %21 = tpu.matmul %17, %20, %cst_19 {dimension_numbers = #tpu.dot_dimension_numbers<[1], [0], [0], [1], [0, 0, 1, 1], [], []>} : vector<8x128xf32>, vector<128x64xf32>, vector<8x64xf32> -> vector<8x64xf32>
    %22 = arith.maximumf %19, %21 : vector<8x64xf32>
    %c0_20 = arith.constant 0 : index
    %c0_21 = arith.constant 0 : index
    %c0_22 = arith.constant 0 : index
    %23 = vector.load %arg7[%c0_20, %c0_21, %c0_22] : memref<1x8x64xf32, #tpu.memory_space<vmem>>, vector<1x8x64xf32>
    %24 = vector.shape_cast %23 : vector<1x8x64xf32> to vector<8x64xf32>
    %25 = vector.shape_cast %22 : vector<8x64xf32> to vector<1x8x64xf32>
    tpu.vector_store %arg7[%c0_20, %c0_21, %c0_22], %25 {strides = array<i32>} : memref<1x8x64xf32, #tpu.memory_space<vmem>>, vector<1x8x64xf32>,
    return
  }
  func.func @transform_0(%arg0: i32) -> (i32, i32, i32) {
    %c0_i32 = arith.constant 0 : i32
    %c0_i32_0 = arith.constant 0 : i32
    %c0_i32_1 = arith.constant 0 : i32
    return %arg0, %c0_i32, %c0_i32_0 : i32, i32, i32
  }
  func.func @transform_1(%arg0: i32) -> (i32, i32) {
    %c0_i32 = arith.constant 0 : i32
    %c0_i32_0 = arith.constant 0 : i32
    %c0_i32_1 = arith.constant 0 : i32
    return %c0_i32, %c0_i32_0 : i32, i32
  }
  func.func @transform_2(%arg0: i32) -> (i32, i32) {
    %c0_i32 = arith.constant 0 : i32
    %c0_i32_0 = arith.constant 0 : i32
    %c0_i32_1 = arith.constant 0 : i32
    return %c0_i32, %c0_i32_0 : i32, i32
  }
  func.func @transform_3(%arg0: i32) -> (i32, i32) {
    %c0_i32 = arith.constant 0 : i32
    %c0_i32_0 = arith.constant 0 : i32
    %c0_i32_1 = arith.constant 0 : i32
    return %c0_i32, %c0_i32_0 : i32, i32
  }
  func.func @transform_4(%arg0: i32) -> (i32, i32) {
    %c0_i32 = arith.constant 0 : i32
    %c0_i32_0 = arith.constant 0 : i32
    %c0_i32_1 = arith.constant 0 : i32
    return %c0_i32, %c0_i32_0 : i32, i32
  }
  func.func @transform_5(%arg0: i32) -> (i32, i32, i32) {
    %c0_i32 = arith.constant 0 : i32
    %c0_i32_0 = arith.constant 0 : i32
    %c0_i32_1 = arith.constant 0 : i32
    return %arg0, %c0_i32, %c0_i32_0 : i32, i32, i32
  }
  func.func @transform_6(%arg0: i32) -> (i32, i32, i32) {
    %c0_i32 = arith.constant 0 : i32
    %c0_i32_0 = arith.constant 0 : i32
    %c0_i32_1 = arith.constant 0 : i32
    return %arg0, %c0_i32, %c0_i32_0 : i32, i32, i32
  }
}

</mosaic_0001>

<bundles_post_ra>
// kernel: encoder_block_forward.3
= control target key start
LH: loop header
LB: loop body
LE: loop exit
PB: predicated region body
PF: predicated region fallthrough
CT: control target
= control target key end

     0   :  { %s1044_s15 = smov 0   ;;  %s1200_s0 = inlined_call_operand.vmem [shape: f32[2,16,64], index: 0, kind: input, shape index: {}]   ;;  %s1201_s1 = inlined_call_operand.vmem [shape: f32[3,64,128], index: 1, kind: input, shape index: {}]   ;;  %s1202_s2 = inlined_call_operand.vmem [shape: f32[128,8], index: 2, kind: input, shape index: {}]   ;;  %s1203_s3 = inlined_call_operand.vmem [shape: f32[2,16,128], index: 3, kind: output, shape index: {0}]   ;;  %s1204_s4 = inlined_call_operand.vmem [shape: f32[2,2,8], index: 4, kind: output, shape index: {1}]  }
   0x1 LB: > { %s772_s16 = sadd.s32 4294967295, %s1016_s15   ;;  %p776_p0 = scmp.ge.s32.totalorder %s1016_s15, 1  ;;  %s1016_s15 = sphi %s1044_s15, %s15_s15  }
   0x2   : > { %p165_p1 = scmp.lt.s32.totalorder %s1016_s15, 3 }
   0x4   : > { %p166_p2 = pnand %p776_p0, %p165_p1 }
   0x5   : > { %p195_p3 = scmp.lt.s32.totalorder (!%p166_p2), %s772_s16, 1 }
   0x6   : > { %169 = sbr.rel (%p166_p2) target bundleno = 457 (0x1c9), region = 32 }
   0xb   : > { %v789_v0 = vld [vmem:[%s1201_s1 + $0x78] sm:$0xff]  ;;  %v788_v2 = vld [vmem:[%s1201_s1 + $0x70] sm:$0xff]  ;;  %vm211_vm0 = vcmask 516096   ;;  %v787_v4 = vld [vmem:[%s1201_s1 + $0x68] sm:$0xff]  ;;  %s1206_s16 = smov (!%p195_p3, %s772_s16), 1  ;;  %v1018_v6 = vmov 0.0  }
   0xc   : > { %v226_v1 = vld [vmem:[%s1201_s1 + $0x38] sm:$0xff]  ;;  %874 = vmatprep.subr.mxu0 %v789_v0  ;;  %v225_v3 = vld [vmem:[%s1201_s1 + $0x30] sm:$0xff]  ;;  %v224_v5 = vld [vmem:[%s1201_s1 + $0x28] sm:$0xff]  ;;  %212 = vst.msk [vmem:[#allocation2] sm:$0x1] %vm211_vm0, %v1018_v6  ;;  %s806_s7 = sshll.u32 %s1206_s16, 4 }
   0xd   : > { %893 = vmatprep.subr.mxu1 %v226_v1  ;;  %875 = vmatpush3.msra.mxu0 %v789_v0  ;;  %213 = vst.msk [vmem:[#allocation2 + $0x11] sm:$0x1] %vm211_vm0, %v1018_v6  ;;  %v786_v7 = vld [vmem:[%s1201_s1 + $0x60] sm:$0xff]  ;;  %vm214_vm1 = vcmask 523264   ;;  %v785_v9 = vld [vmem:[%s1201_s1 + $0x58] sm:$0xff]  ;;  %s199_s12 = scalar_lea.vmem %s1200_s0, %s806_s7  ;;  %v784_v13 = vld [vmem:[%s1201_s1 + $0x50] sm:$0xff]  ;;  %s204_s8 = scalar_lea.vmem %s1203_s3, %s806_s7 }
   0xe   : > { %894 = vmatpush3.msra.mxu1 %v226_v1  ;;  %876 = vmatprep.subr.mxu0 %v788_v2  ;;  %v223_v8 = vld [vmem:[%s1201_s1 + $0x20] sm:$0xff]  ;;  %v222_v10 = vld [vmem:[%s1201_s1 + $0x18] sm:$0xff]  ;;  %v210_v12 = vld [vmem:[%s199_s12 + $0x8] sm:$0xff]  ;;  %vm664_vm2 = vcmask 64512   ;;  %s781_s7 = sshll.u32 %s1206_s16, 1  ;;  %vm674_vm3 = vcmask 57344  }
   0xf   : > { %895 = vmatprep.subr.mxu1 %v225_v3  ;;  %877 = vmatpush3.msra.mxu0 %v788_v2  ;;  %v209_v11 = vld [vmem:[%s199_s12] sm:$0xff]  ;;  %216 = vst.msk [vmem:[#allocation2 + $0x9] sm:$0xff] %vm214_vm1, %v210_v12  ;;  %v221_v14 = vld [vmem:[%s1201_s1 + $0x10] sm:$0xff]  ;;  %v783_v15 = vld [vmem:[%s1201_s1 + $0x48] sm:$0xff]  ;;  %s208_s11 = scalar_lea.vmem %s1204_s4, %s781_s7 }
  0x10   : > { %896 = vmatpush3.msra.mxu1 %v225_v3  ;;  %878 = vmatprep.subr.mxu0 %v787_v4  ;;  %215 = vst.msk [vmem:[#allocation2 + $0x1] sm:$0xff] %vm214_vm1, %v209_v11  ;;  %v220_v16 = vld [vmem:[%s1201_s1 + $0x8] sm:$0xff]  ;;  %v782_v17 = vld [vmem:[%s1201_s1 + $0x40] sm:$0xff]  ;;  %v801_v23 = vld [vmem:[%s1201_s1 + $0xb8] sm:$0xff] }
  0x11   : > { %897 = vmatprep.subr.mxu1 %v224_v5  ;;  %879 = vmatpush3.msra.mxu0 %v787_v4  ;;  %v219_v18 = vld [vmem:[%s1201_s1] sm:$0xff]  ;;  %v511_v25 = vld [vmem:[%s1202_s2 + $0x78] sm:$0xff]  ;;  %v800_v26 = vld [vmem:[%s1201_s1 + $0xb0] sm:$0xff] }
  0x12   : > { %898 = vmatpush3.msra.mxu1 %v224_v5  ;;  %880 = vmatprep.subr.mxu0 %v786_v7  ;;  %v510_v27 = vld [vmem:[%s1202_s2 + $0x70] sm:$0xff]  ;;  %v799_v28 = vld [vmem:[%s1201_s1 + $0xa8] sm:$0xff]  ;;  %v798_v30 = vld [vmem:[%s1201_s1 + $0xa0] sm:$0xff] }
  0x13   : > { %899 = vmatprep.subr.mxu1 %v223_v8  ;;  %881 = vmatpush3.msra.mxu0 %v786_v7  ;;  %v509_v29 = vld [vmem:[%s1202_s2 + $0x68] sm:$0xff]  ;;  %v508_v31 = vld [vmem:[%s1202_s2 + $0x60] sm:$0xff]  ;;  %v797_v32 = vld [vmem:[%s1201_s1 + $0x98] sm:$0xff] }
  0x14   : > { %900 = vmatpush3.msra.mxu1 %v223_v8  ;;  %882 = vmatprep.subr.mxu0 %v785_v9  ;;  %v507_v33 = vld [vmem:[%s1202_s2 + $0x58] sm:$0xff]  ;;  %v796_v34 = vld [vmem:[%s1201_s1 + $0x90] sm:$0xff]  ;;  %v795_v35 = vld [vmem:[%s1201_s1 + $0x88] sm:$0xff] }
  0x15   : > { %901 = vmatprep.subr.mxu1 %v222_v10  ;;  %883 = vmatpush3.msra.mxu0 %v785_v9  ;;  %v794_v36 = vld [vmem:[%s1201_s1 + $0x80] sm:$0xff]  ;;  %v506_v38 = vld [vmem:[%s1202_s2 + $0x50] sm:$0xff]  ;;  %v505_v39 = vld [vmem:[%s1202_s2 + $0x48] sm:$0xff] }
  0x16   : > { %902 = vmatpush3.msra.mxu1 %v222_v10  ;;  %884 = vmatprep.subr.mxu0 %v784_v13  ;;  %v228_v21 = vld [vmem:[#allocation2 + $0x9] sm:$0xff]  ;;  %v504_v40 = vld [vmem:[%s1202_s2 + $0x40] sm:$0xff]  ;;  %v503_v41 = vld [vmem:[%s1202_s2 + $0x38] sm:$0xff] }
  0x17   : > { %903 = vmatprep.subr.mxu1 %v221_v14  ;;  %885 = vmatpush3.msra.mxu0 %v784_v13  ;;  %v227_v19 = vld [vmem:[#allocation2 + $0x1] sm:$0xff]  ;;  %v401_v37 = vld [vmem:[#allocation2 + $0xa] sm:$0xff]  ;;  %v499_v45 = vld [vmem:[%s1202_s2 + $0x18] sm:$0xff] }
  0x18   : > { %904 = vmatpush3.msra.mxu1 %v221_v14  ;;  %886 = vmatprep.subr.mxu0 %v783_v15  ;;  %v217_v20 = vld [vmem:[#allocation2] sm:$0xff]  ;;  %v218_v22 = vld [vmem:[#allocation2 + $0x8] sm:$0xff]  ;;  %v502_v42 = vld [vmem:[%s1202_s2 + $0x30] sm:$0xff] }
  0x19   : > { %905 = vmatprep.subr.mxu1 %v220_v16  ;;  %887 = vmatpush3.msra.mxu0 %v783_v15  ;;  %v400_v24 = vld [vmem:[#allocation2 + $0x2] sm:$0xff]  ;;  %v498_v46 = vld [vmem:[%s1202_s2 + $0x10] sm:$0xff] }
  0x1a   : > { %906 = vmatpush3.msra.mxu1 %v220_v16  ;;  %888 = vmatprep.subr.mxu0 %v782_v17  ;;  %v501_v43 = vld [vmem:[%s1202_s2 + $0x28] sm:$0xff]  ;;  %v500_v44 = vld [vmem:[%s1202_s2 + $0x20] sm:$0xff] }
  0x1b   : > { %907 = vmatprep.subr.mxu1 %v219_v18  ;;  %889 = vmatpush3.msra.mxu0 %v782_v17  ;;  %v497_v47 = vld [vmem:[%s1202_s2 + $0x8] sm:$0xff]  ;;  %v496_v48 = vld [vmem:[%s1202_s2] sm:$0xff] }
  0x1c   : > { %890 = vmatprep.mubr.msk.f32.mxu0 %vm214_vm1, %v227_v19  ;;  %908 = vmatpush3.msra.mxu1 %v219_v18 }
  0x1d   : > { %909 = vmatprep.mubr.msk.f32.mxu1 %vm214_vm1, %v217_v20  ;;  %891 = vmatmul.mubr.msk.f32.vlgmr.msra.gmra.mxu0 %vm214_vm1, %v228_v21 }
  0x1e   : > { %910 = vmatmul.mubr.msk.f32.vlgmr.msra.gmra.mxu1 %vm214_vm1, %v218_v22  ;;  %912 = vmatprep.subr.mxu0 %v801_v23 }
  0x1f   : > { %928 = vmatprep.mubr.msk.f32.mxu0 %vm214_vm1, %v400_v24  ;;  %913 = vmatpush3.msra.mxu0 %v801_v23 }
  0x20   : > { %931 = vmatprep.subr.mxu1 %v511_v25  ;;  %914 = vmatprep.subr.mxu0 %v800_v26 }
  0x21   : > { %932 = vmatpush3.msra.mxu1 %v511_v25  ;;  %915 = vmatpush3.msra.mxu0 %v800_v26 }
  0x22   : > { %933 = vmatprep.subr.mxu1 %v510_v27  ;;  %916 = vmatprep.subr.mxu0 %v799_v28 }
  0x23   : > { %934 = vmatpush3.msra.mxu1 %v510_v27  ;;  %917 = vmatpush3.msra.mxu0 %v799_v28 }
  0x24   : > { %935 = vmatprep.subr.mxu1 %v509_v29  ;;  %918 = vmatprep.subr.mxu0 %v798_v30 }
  0x25   : > { %936 = vmatpush3.msra.mxu1 %v509_v29  ;;  %919 = vmatpush3.msra.mxu0 %v798_v30 }
  0x26   : > { %937 = vmatprep.subr.mxu1 %v508_v31  ;;  %920 = vmatprep.subr.mxu0 %v797_v32 }
  0x27   : > { %938 = vmatpush3.msra.mxu1 %v508_v31  ;;  %921 = vmatpush3.msra.mxu0 %v797_v32 }
  0x28   : > { %939 = vmatprep.subr.mxu1 %v507_v33  ;;  %922 = vmatprep.subr.mxu0 %v796_v34 }
  0x29   : > { %940 = vmatpush3.msra.mxu1 %v507_v33  ;;  %923 = vmatpush3.msra.mxu0 %v796_v34 }
  0x2a   : > { %924 = vmatprep.subr.mxu0 %v795_v35  ;;  %941 = vmatprep.subr.mxu1 %v506_v38 }
  0x2b   : > { %925 = vmatpush3.msra.mxu0 %v795_v35  ;;  %942 = vmatpush3.msra.mxu1 %v506_v38 }
  0x2c   : > { %926 = vmatprep.subr.mxu0 %v794_v36  ;;  %943 = vmatprep.subr.mxu1 %v505_v39 }
  0x2d   : > { %927 = vmatpush3.msra.mxu0 %v794_v36  ;;  %944 = vmatpush3.msra.mxu1 %v505_v39 }
  0x2e   : > { %929 = vmatmul.mubr.msk.f32.vlgmr.msra.gmra.mxu0 %vm214_vm1, %v401_v37  ;;  %966 = vmatprep.subr.mxu0 %v511_v25 }
  0x2f   : > { %967 = vmatpush3.msra.mxu0 %v511_v25  ;;  %945 = vmatprep.subr.mxu1 %v504_v40 }
  0x30   : > { %968 = vmatprep.subr.mxu0 %v510_v27  ;;  %946 = vmatpush3.msra.mxu1 %v504_v40 }
  0x31   : > { %969 = vmatpush3.msra.mxu0 %v510_v27  ;;  %947 = vmatprep.subr.mxu1 %v503_v41 }
  0x32   : > { %970 = vmatprep.subr.mxu0 %v509_v29  ;;  %948 = vmatpush3.msra.mxu1 %v503_v41 }
  0x33   : > { %971 = vmatpush3.msra.mxu0 %v509_v29  ;;  %949 = vmatprep.subr.mxu1 %v502_v42 }
  0x34   : > { %972 = vmatprep.subr.mxu0 %v508_v31  ;;  %950 = vmatpush3.msra.mxu1 %v502_v42 }
  0x35   : > { %973 = vmatpush3.msra.mxu0 %v508_v31  ;;  %951 = vmatprep.subr.mxu1 %v501_v43 }
  0x36   : > { %974 = vmatprep.subr.mxu0 %v507_v33  ;;  %952 = vmatpush3.msra.mxu1 %v501_v43 }
  0x37   : > { %975 = vmatpush3.msra.mxu0 %v507_v33  ;;  %953 = vmatprep.subr.mxu1 %v500_v44 }
  0x38   : > { %976 = vmatprep.subr.mxu0 %v506_v38  ;;  %954 = vmatpush3.msra.mxu1 %v500_v44 }
  0x39   : > { %977 = vmatpush3.msra.mxu0 %v506_v38  ;;  %955 = vmatprep.subr.mxu1 %v499_v45 }
  0x3a   : > { %978 = vmatprep.subr.mxu0 %v505_v39  ;;  %956 = vmatpush3.msra.mxu1 %v499_v45 }
  0x3b   : > { %979 = vmatpush3.msra.mxu0 %v505_v39  ;;  %957 = vmatprep.subr.mxu1 %v498_v46 }
  0x3c   : > { %980 = vmatprep.subr.mxu0 %v504_v40  ;;  %958 = vmatpush3.msra.mxu1 %v498_v46 }
  0x3d   : > { %981 = vmatpush3.msra.mxu0 %v504_v40  ;;  %959 = vmatprep.subr.mxu1 %v497_v47 }
  0x3e   : > { %982 = vmatprep.subr.mxu0 %v503_v41  ;;  %960 = vmatpush3.msra.mxu1 %v497_v47 }
  0x3f   : > { %983 = vmatpush3.msra.mxu0 %v503_v41  ;;  %961 = vmatprep.subr.mxu1 %v496_v48 }
  0x40   : > { %984 = vmatprep.subr.mxu0 %v502_v42  ;;  %962 = vmatpush3.msra.mxu1 %v496_v48 }
  0x41   : > { %985 = vmatpush3.msra.mxu0 %v502_v42 }
  0x42   : > { %986 = vmatprep.subr.mxu0 %v501_v43 }
  0x43   : > { %987 = vmatpush3.msra.mxu0 %v501_v43 }
  0x44   : > { %988 = vmatprep.subr.mxu0 %v500_v44 }
  0x45   : > { %989 = vmatpush3.msra.mxu0 %v500_v44 }
  0x46   : > { %990 = vmatprep.subr.mxu0 %v499_v45 }
  0x47   : > { %991 = vmatpush3.msra.mxu0 %v499_v45 }
  0x48   : > { %992 = vmatprep.subr.mxu0 %v498_v46 }
  0x49   : > { %993 = vmatpush3.msra.mxu0 %v498_v46 }
  0x4a   : > { %994 = vmatprep.subr.mxu0 %v497_v47 }
  0x4b   : > { %995 = vmatpush3.msra.mxu0 %v497_v47 }
  0x4c   : > { %996 = vmatprep.subr.mxu0 %v496_v48 }
  0x4d   : > { %997 = vmatpush3.msra.mxu0 %v496_v48 }
  0xdd   : > { %v892_v49 = vpop.f32.mrf.mxu0 }
  0xde   : > { %v911_v50 = vpop.f32.mrf.mxu1 }
  0xdf   : > { %v310_v51 = vpop.f32.mrf.mxu0  ;;  %v397_v53 = vadd.f32 %v911_v50, %v892_v49 }
  0xe0   : > { %v391_v52 = vpop.f32.mrf.mxu1 }
  0xe1   : > { %v392_v55 = vadd.f32 %v391_v52, %v310_v51 }
  0xee   : > { %v930_v54 = vpop.f32.mrf.mxu0 }
  0xef   : > { %v493_v56 = vadd.f32 %v930_v54, %v397_v53 }
  0xf0   : > { %v483_v57 = vpop.f32.mrf.mxu0 }
  0xf1   : > { %495 = vst [vmem:[%s204_s8 + $0x8] sm:$0xff] %v493_v56  ;;  %v492_v58 = vadd.f32 %v483_v57, %v392_v55  ;;  %v588_v60 = vmul.f32 %v493_v56, %v493_v56 }
  0xf3   : > { %494 = vst [vmem:[%s204_s8] sm:$0xff] %v492_v58  ;;  %963 = vmatprep.mubr.f32.mxu1 %v492_v58  ;;  %v587_v59 = vmul.f32 %v492_v58, %v492_v58 }
  0xf4   : > { %964 = vmatmul.mubr.f32.vlgmr.msra.gmra.mxu1 %v493_v56 }
  0xf5   : > { %998 = vmatprep.mubr.f32.mxu0 %v587_v59 }
  0xf6   : > { %999 = vmatmul.mubr.f32.vlgmr.msra.gmra.mxu0 %v588_v60 }
 0x1b4   : > { %v965_v61 = vpop.f32.mrf.mxu1 }
 0x1b5   : > { %v666_v0 = vsel %vm664_vm2, %v965_v61, 0.0 }
 0x1b6   : > { %v578_v62 = vpop.f32.mrf.mxu1  ;;  %v1000_v63 = vpop.f32.mrf.mxu0 }
 0x1b7   : > { %v665_v1 = vsel %vm664_vm2, %v578_v62, 0.0  ;;  %v677_v4 = vsel %vm664_vm2, %v1000_v63, 0.0 }
 0x1b8   : > { %v667_v2 = vadd.f32 %v666_v0, %v665_v1  ;;  %v655_v3 = vpop.f32.mrf.mxu0 }
 0x1b9   : > { %v676_v5 = vsel %vm664_vm2, %v655_v3, 0.0 }
 0x1ba   : > { %v668_v6 = vrot.slane %v667_v2, 4  ;;  %v678_v7 = vadd.f32 %v677_v4, %v676_v5 }
 0x1bc   : > { %v669_v8 = vadd.f32 %v668_v6, %v667_v2  ;;  %v679_v9 = vrot.slane %v678_v7, 4 }
 0x1be   : > { %v670_v10 = vrot.slane %v669_v8, 2  ;;  %v680_v11 = vadd.f32 %v679_v9, %v678_v7 }
 0x1c0   : > { %v671_v12 = vadd.f32 %v670_v10, %v669_v8  ;;  %v681_v13 = vrot.slane %v680_v11, 2 }
 0x1c2   : > { %v672_v14 = vrot.slane %v671_v12, 1  ;;  %v682_v15 = vadd.f32 %v681_v13, %v680_v11 }
 0x1c4   : > { %v673_v16 = vadd.f32 %v672_v14, %v671_v12  ;;  %v683_v17 = vrot.slane %v682_v15, 1 }
 0x1c6   : > { %675 = vst.msk [vmem:[%s208_s11] sm:$0x1] %vm674_vm3, %v673_v16  ;;  %v684_v18 = vadd.f32 %v683_v17, %v682_v15 }
 0x1c8   : > { %685 = vst.msk [vmem:[%s208_s11 + $0x1] sm:$0x1] %vm674_vm3, %v684_v18 }
 0x1c9 PF: > { %s15_s15 = sadd.s32 1, %s1016_s15  }
 0x1ca   : > { %p12_p4 = scmp.ge.s32.totalorder %s15_s15, 4  }
 0x1cc   :  { %14 = sbr.rel (!%p12_p4) target bundleno = 1 (0x1), region = 76 }

// kernel: tile.23
= control target key start
LH: loop header
LB: loop body
LE: loop exit
PB: predicated region body
PF: predicated region fallthrough
CT: control target
= control target key end

     0   :  { %s28_s0 = inlined_call_operand.vmem [shape: f32[8], index: 0, kind: input, shape index: {}]   ;;  %s29_s1 = inlined_call_operand.vmem [shape: f32[16,8], index: 1, kind: output, shape index: {}]  }
   0x1   :  { %v4_v0 = vld [vmem:[%s28_s0] ss:$0 sm:$0xff] }
   0x2   :  { %5 = vst [vmem:[%s29_s1] sm:$0xff] %v4_v0  ;;  %8 = vst [vmem:[%s29_s1 + $0x8] sm:$0xff] %v4_v0 }

// kernel: tile.24
= control target key start
LH: loop header
LB: loop body
LE: loop exit
PB: predicated region body
PF: predicated region fallthrough
CT: control target
= control target key end

     0   :  { %s133_s10 = smov 120   ;;  %s134_s11 = smov 104   ;;  %vm3_vm0 = vcmask 64512   ;;  %vm9_vm1 = vcmask 1048512   ;;  %vm15_vm2 = vcmask 982912   ;;  %vm21_vm3 = vcmask 917312   ;;  %s209_s0 = inlined_call_operand.vmem [shape: f32[16,8], index: 0, kind: input, shape index: {}]   ;;  %s210_s1 = inlined_call_operand.vmem [shape: f32[1,128], index: 1, kind: output, shape index: {}]  }
   0x1   :  { %v103_v0 = vld [vmem:[%s209_s0 + $0xf] sm:$0x1]   ;;  %v105_v1 = vld [vmem:[%s209_s0 + $0xd] sm:$0x1]   ;;  %v104_v2 = vld [vmem:[%s209_s0 + $0xe] sm:$0x1]  }
   0x2   :  { %7 = vrot.lane.b32.xlu0 %v103_v0, %s133_s10  ;;  %19 = vrot.lane.b32.xlu1 %v105_v1, %s134_s11  ;;  %v106_v3 = vld [vmem:[%s209_s0 + $0xc] sm:$0x1]   ;;  %s135_s16 = smov 112   ;;  %s136_s17 = smov 96   ;;  %v107_v4 = vld [vmem:[%s209_s0 + $0xb] sm:$0x1]  }
   0x3   :  { %v108_v5 = vld [vmem:[%s209_s0 + $0xa] sm:$0x1]   ;;  %v2_v6 = vld [vmem:[%s209_s0] sm:$0x1]   ;;  %s137_s24 = smov 88   ;;  %s138_s25 = smov 80  }
   0x4   :  { %4 = vst.msk [vmem:[#allocation0] sm:$0x1] %vm3_vm0, %v2_v6   ;;  %v109_v7 = vld [vmem:[%s209_s0 + $0x9] sm:$0x1]   ;;  %v110_v8 = vld [vmem:[%s209_s0 + $0x8] sm:$0x1]  }
   0x5   :  { %s139_s30 = smov 72   ;;  %s140_s2 = smov 64   ;;  %v111_v9 = vld [vmem:[%s209_s0 + $0x7] sm:$0x1]   ;;  %v112_v10 = vld [vmem:[%s209_s0 + $0x6] sm:$0x1]  }
   0x6   :  { %13 = vrot.lane.b32.xlu0 %v104_v2, %s135_s16  ;;  %25 = vrot.lane.b32.xlu1 %v106_v3, %s136_s17  ;;  %s141_s7 = smov 56   ;;  %s142_s8 = smov 48   ;;  %v113_v11 = vld [vmem:[%s209_s0 + $0x5] sm:$0x1]   ;;  %v114_v12 = vld [vmem:[%s209_s0 + $0x4] sm:$0x1]  }
   0x7   :  { %s143_s13 = smov 40   ;;  %s144_s14 = smov 32   ;;  %v115_v13 = vld [vmem:[%s209_s0 + $0x3] sm:$0x1]   ;;  %v116_v14 = vld [vmem:[%s209_s0 + $0x2] sm:$0x1]  }
   0x8   :  { %s145_s19 = smov 24   ;;  %s146_s20 = smov 16   ;;  %v117_v15 = vld [vmem:[%s209_s0 + $0x1] sm:$0x1]   ;;  %vm27_vm4 = vcmask 851712   ;;  %vm33_vm5 = vcmask 786112  }
   0x9   :  { %s147_s0 = smov 8   ;;  %vm39_vm6 = vcmask 720512   ;;  %vm45_vm7 = vcmask 654912   ;;  %vm51_vm8 = vcmask 589312   ;;  %vm57_vm9 = vcmask 523712  }
   0xa   :  { %31 = vrot.lane.b32.xlu0 %v107_v4, %s137_s24  ;;  %37 = vrot.lane.b32.xlu1 %v108_v5, %s138_s25  ;;  %vm63_vm10 = vcmask 458112   ;;  %vm69_vm11 = vcmask 392512   ;;  %vm75_vm12 = vcmask 326912   ;;  %vm81_vm13 = vcmask 261312  }
   0xb   :  { %vm87_vm14 = vcmask 195712   ;;  %vm93_vm15 = vcmask 130112  }
   0xe   :  { %43 = vrot.lane.b32.xlu0 %v109_v7, %s139_s30  ;;  %49 = vrot.lane.b32.xlu1 %v110_v8, %s140_s2 }
  0x12   :  { %55 = vrot.lane.b32.xlu0 %v111_v9, %s141_s7  ;;  %61 = vrot.lane.b32.xlu1 %v112_v10, %s142_s8 }
  0x16   :  { %67 = vrot.lane.b32.xlu0 %v113_v11, %s143_s13  ;;  %73 = vrot.lane.b32.xlu1 %v114_v12, %s144_s14 }
  0x1a   :  { %79 = vrot.lane.b32.xlu0 %v115_v13, %s145_s19  ;;  %85 = vrot.lane.b32.xlu1 %v116_v14, %s146_s20 }
  0x1e   :  { %91 = vrot.lane.b32.xlu0 %v117_v15, %s147_s0 }
  0x74   :  { %v8_v16 = vpop.permute.xlu0 %7   ;;  %v20_v17 = vpop.permute.xlu1 %19  }
  0x75   :  { %10 = vst.msk [vmem:[#allocation0] sm:$0x1] %vm9_vm1, %v8_v16  }
  0x78   :  { %v14_v18 = vpop.permute.xlu0 %13   ;;  %v26_v19 = vpop.permute.xlu1 %25  }
  0x79   :  { %16 = vst.msk [vmem:[#allocation0] sm:$0x1] %vm15_vm2, %v14_v18  }
  0x7a   :  { %22 = vst.msk [vmem:[#allocation0] sm:$0x1] %vm21_vm3, %v20_v17  }
  0x7b   :  { %28 = vst.msk [vmem:[#allocation0] sm:$0x1] %vm27_vm4, %v26_v19  }
  0x7c   :  { %v32_v20 = vpop.permute.xlu0 %31   ;;  %v38_v21 = vpop.permute.xlu1 %37  }
  0x7d   :  { %34 = vst.msk [vmem:[#allocation0] sm:$0x1] %vm33_vm5, %v32_v20  }
  0x7e   :  { %40 = vst.msk [vmem:[#allocation0] sm:$0x1] %vm39_vm6, %v38_v21  }
  0x80   :  { %v44_v22 = vpop.permute.xlu0 %43   ;;  %v50_v23 = vpop.permute.xlu1 %49  }
  0x81   :  { %46 = vst.msk [vmem:[#allocation0] sm:$0x1] %vm45_vm7, %v44_v22  }
  0x82   :  { %52 = vst.msk [vmem:[#allocation0] sm:$0x1] %vm51_vm8, %v50_v23  }
  0x84   :  { %v56_v24 = vpop.permute.xlu0 %55   ;;  %v62_v25 = vpop.permute.xlu1 %61  }
  0x85   :  { %58 = vst.msk [vmem:[#allocation0] sm:$0x1] %vm57_vm9, %v56_v24  }
  0x86   :  { %64 = vst.msk [vmem:[#allocation0] sm:$0x1] %vm63_vm10, %v62_v25  }
  0x88   :  { %v68_v26 = vpop.permute.xlu0 %67   ;;  %v74_v27 = vpop.permute.xlu1 %73  }
  0x89   :  { %70 = vst.msk [vmem:[#allocation0] sm:$0x1] %vm69_vm11, %v68_v26  }
  0x8a   :  { %76 = vst.msk [vmem:[#allocation0] sm:$0x1] %vm75_vm12, %v74_v27  }
  0x8c   :  { %v80_v28 = vpop.permute.xlu0 %79   ;;  %v86_v29 = vpop.permute.xlu1 %85  }
  0x8d   :  { %82 = vst.msk [vmem:[#allocation0] sm:$0x1] %vm81_vm13, %v80_v28  }
  0x8e   :  { %88 = vst.msk [vmem:[#allocation0] sm:$0x1] %vm87_vm14, %v86_v29  }
  0x90   :  { %v92_v30 = vpop.permute.xlu0 %91  }
  0x91   :  { %94 = vst.msk [vmem:[#allocation0] sm:$0x1] %vm93_vm15, %v92_v30  }
  0x98   :  { %v99_v31 = vld [vmem:[#allocation0] sm:$0x1] }
  0x99   :  { %102 = vst [vmem:[%s210_s1] sm:$0x1] %v99_v31 }

// kernel: encoder_block_forward.5
= control target key start
LH: loop header
LB: loop body
LE: loop exit
PB: predicated region body
PF: predicated region fallthrough
CT: control target
= control target key end

     0   :  { %s728_s21 = smov 0   ;;  %s898_s0 = inlined_call_operand.vmem [shape: f32[2,16,128], index: 0, kind: input, shape index: {}]   ;;  %s899_s1 = inlined_call_operand.vmem [shape: f32[1,128], index: 1, kind: input, shape index: {}]   ;;  %s900_s2 = inlined_call_operand.vmem [shape: f32[1,128], index: 2, kind: input, shape index: {}]   ;;  %s901_s3 = inlined_call_operand.vmem [shape: f32[128,64], index: 3, kind: input, shape index: {}]   ;;  %s902_s4 = inlined_call_operand.vmem [shape: f32[128,64], index: 4, kind: input, shape index: {}]   ;;  %s903_s5 = inlined_call_operand.vmem [shape: f32[2,16,128], index: 5, kind: output, shape index: {0}]   ;;  %s904_s6 = inlined_call_operand.vmem [shape: f32[2,8,64], index: 6, kind: output, shape index: {1}]  }
   0x1 LB: > { %s552_s22 = sadd.s32 4294967295, %s689_s21   ;;  %p556_p0 = scmp.ge.s32.totalorder %s689_s21, 1  ;;  %s689_s21 = sphi %s728_s21, %s17_s21  }
   0x2   : > { %p215_p1 = scmp.lt.s32.totalorder %s689_s21, 3 }
   0x4   : > { %p216_p2 = pnand %p556_p0, %p215_p1 }
   0x5   : > { %p249_p3 = scmp.lt.s32.totalorder (!%p216_p2), %s552_s22, 1 }
   0x6   : > { %219 = sbr.rel (%p216_p2) target bundleno = 241 (0xf1), region = 40 }
   0xb   : > { %v306_v0 = vld [vmem:[%s901_s3 + $0x78] sm:$0xff]  ;;  %v691_v2 = vmov 0.0   ;;  %v305_v3 = vld [vmem:[%s901_s3 + $0x70] sm:$0xff]  ;;  %s906_s22 = smov (!%p249_p3, %s552_s22), 1  ;;  %v304_v5 = vld [vmem:[%s901_s3 + $0x68] sm:$0xff]  ;;  %vm692_vm0 = vmmov 0  }
   0xc   : > { %v392_v1 = vld [vmem:[%s902_s4 + $0x78] sm:$0xff]  ;;  %603 = vmatprep.subr.mxu0 %v691_v2  ;;  %638 = vmatprep.subr.mxu1 %v691_v2  ;;  %v391_v4 = vld [vmem:[%s902_s4 + $0x70] sm:$0xff]  ;;  %v390_v6 = vld [vmem:[%s902_s4 + $0x68] sm:$0xff]  ;;  %s567_s11 = sshll.u32 %s906_s22, 4  ;;  %vm464_vm1 = vcmask 523264  }
   0xd   : > { %604 = vmatpush3.msra.mxu0 %v306_v0  ;;  %639 = vmatpush3.msra.mxu1 %v392_v1  ;;  %v303_v7 = vld [vmem:[%s901_s3 + $0x60] sm:$0xff]  ;;  %v302_v9 = vld [vmem:[%s901_s3 + $0x58] sm:$0xff]  ;;  %s253_s24 = scalar_lea.vmem %s898_s0, %s567_s11  ;;  %v301_v11 = vld [vmem:[%s901_s3 + $0x50] sm:$0xff]  ;;  %s825_s26 = scalar_lea.vmem %s903_s5, %s567_s11 }
   0xe   : > { %605 = vmatprep.subr.mxu0 %v691_v2  ;;  %640 = vmatprep.subr.mxu1 %v691_v2  ;;  %v389_v8 = vld [vmem:[%s902_s4 + $0x60] sm:$0xff]  ;;  %v388_v10 = vld [vmem:[%s902_s4 + $0x58] sm:$0xff]  ;;  %v387_v12 = vld [vmem:[%s902_s4 + $0x50] sm:$0xff] }
   0xf   : > { %606 = vmatpush3.msra.mxu0 %v305_v3  ;;  %641 = vmatpush3.msra.mxu1 %v391_v4  ;;  %v300_v13 = vld [vmem:[%s901_s3 + $0x48] sm:$0xff]  ;;  %v263_v15 = vld [vmem:[%s253_s24] sm:$0xff]  ;;  %v298_v25 = vld [vmem:[%s901_s3 + $0x38] sm:$0xff] }
  0x10   : > { %607 = vmatprep.subr.mxu0 %v691_v2  ;;  %642 = vmatprep.subr.mxu1 %v691_v2  ;;  %v386_v14 = vld [vmem:[%s902_s4 + $0x48] sm:$0xff]  ;;  %v562_v17 = vld [vmem:[%s899_s1] ss:$0 sm:$0xff]  ;;  %v384_v26 = vld [vmem:[%s902_s4 + $0x38] sm:$0xff] }
  0x11   : > { %608 = vmatpush3.msra.mxu0 %v304_v5  ;;  %643 = vmatpush3.msra.mxu1 %v390_v6  ;;  %v264_v16 = vld [vmem:[%s253_s24 + $0x8] sm:$0xff]  ;;  %v563_v18 = vld [vmem:[%s900_s2] ss:$0 sm:$0xff]  ;;  %v272_v19 = vmul.f32 %v562_v17, %v263_v15  ;;  %v297_v29 = vld [vmem:[%s901_s3 + $0x30] sm:$0xff] }
  0x12   : > { %609 = vmatprep.subr.mxu0 %v691_v2  ;;  %644 = vmatprep.subr.mxu1 %v691_v2  ;;  %v273_v20 = vmul.f32 %v562_v17, %v264_v16  ;;  %v299_v21 = vld [vmem:[%s901_s3 + $0x40] sm:$0xff]  ;;  %v383_v30 = vld [vmem:[%s902_s4 + $0x30] sm:$0xff]  ;;  %v296_v31 = vld [vmem:[%s901_s3 + $0x28] sm:$0xff] }
  0x13   : > { %610 = vmatpush3.msra.mxu0 %v303_v7  ;;  %645 = vmatpush3.msra.mxu1 %v389_v8  ;;  %v385_v22 = vld [vmem:[%s902_s4 + $0x40] sm:$0xff]  ;;  %v281_v23 = vadd.f32 %v563_v18, %v272_v19  ;;  %v382_v32 = vld [vmem:[%s902_s4 + $0x28] sm:$0xff]  ;;  %v294_v35 = vld [vmem:[%s901_s3 + $0x18] sm:$0xff] }
  0x14   : > { %611 = vmatprep.subr.mxu0 %v691_v2  ;;  %646 = vmatprep.subr.mxu1 %v691_v2  ;;  %v282_v24 = vadd.f32 %v563_v18, %v273_v20  ;;  %v295_v33 = vld [vmem:[%s901_s3 + $0x20] sm:$0xff]  ;;  %v380_v36 = vld [vmem:[%s902_s4 + $0x18] sm:$0xff]  ;;  %v293_v37 = vld [vmem:[%s901_s3 + $0x10] sm:$0xff] }
  0x15   : > { %612 = vmatpush3.msra.mxu0 %v302_v9  ;;  %647 = vmatpush3.msra.mxu1 %v388_v10  ;;  %v283_v27 = vmax.f32 %v281_v23, 0.0  ;;  %v381_v34 = vld [vmem:[%s902_s4 + $0x20] sm:$0xff]  ;;  %v379_v38 = vld [vmem:[%s902_s4 + $0x10] sm:$0xff]  ;;  %v292_v39 = vld [vmem:[%s901_s3 + $0x8] sm:$0xff] }
  0x16   : > { %613 = vmatprep.subr.mxu0 %v691_v2  ;;  %648 = vmatprep.subr.mxu1 %v691_v2  ;;  %v284_v28 = vmax.f32 %v282_v24, 0.0  ;;  %v378_v40 = vld [vmem:[%s902_s4 + $0x8] sm:$0xff]  ;;  %v291_v43 = vld [vmem:[%s901_s3] sm:$0xff] }
  0x17   : > { %614 = vmatpush3.msra.mxu0 %v301_v11  ;;  %649 = vmatpush3.msra.mxu1 %v387_v12  ;;  %285 = vst [vmem:[%s825_s26] sm:$0xff] %v283_v27  ;;  %v377_v44 = vld [vmem:[%s902_s4] sm:$0xff] }
  0x18   : > { %615 = vmatprep.subr.mxu0 %v691_v2  ;;  %650 = vmatprep.subr.mxu1 %v691_v2  ;;  %286 = vst [vmem:[%s825_s26 + $0x8] sm:$0xff] %v284_v28 }
  0x19   : > { %616 = vmatpush3.msra.mxu0 %v300_v13  ;;  %651 = vmatpush3.msra.mxu1 %v386_v14 }
  0x1a   : > { %617 = vmatprep.subr.mxu0 %v691_v2  ;;  %652 = vmatprep.subr.mxu1 %v691_v2 }
  0x1b   : > { %618 = vmatpush3.msra.mxu0 %v299_v21  ;;  %653 = vmatpush3.msra.mxu1 %v385_v22 }
  0x1c   : > { %619 = vmatprep.subr.mxu0 %v691_v2  ;;  %654 = vmatprep.subr.mxu1 %v691_v2 }
  0x1d   : > { %620 = vmatpush3.msra.mxu0 %v298_v25  ;;  %655 = vmatpush3.msra.mxu1 %v384_v26 }
  0x1e   : > { %621 = vmatprep.subr.mxu0 %v691_v2  ;;  %656 = vmatprep.subr.mxu1 %v691_v2 }
  0x1f   : > { %622 = vmatpush3.msra.mxu0 %v297_v29  ;;  %657 = vmatpush3.msra.mxu1 %v383_v30  ;;  %v287_v41 = vld [vmem:[%s825_s26] ss:$2 sm:$0xff]  ;;  %v564_v42 = vld [vmem:[%s825_s26 + $0x1] ss:$2 sm:$0xff]  ;;  %s561_s26 = sshll.u32 %s906_s22, 3 }
  0x20   : > { %623 = vmatprep.subr.mxu0 %v691_v2  ;;  %658 = vmatprep.subr.mxu1 %v691_v2  ;;  %v290_v45 = vmax.f32 %v287_v41, %v564_v42  ;;  %s262_s12 = scalar_lea.vmem %s904_s6, %s561_s26 }
  0x21   : > { %624 = vmatpush3.msra.mxu0 %v296_v31  ;;  %659 = vmatpush3.msra.mxu1 %v382_v32 }
  0x22   : > { %625 = vmatprep.subr.mxu0 %v691_v2  ;;  %660 = vmatprep.subr.mxu1 %v691_v2 }
  0x23   : > { %626 = vmatpush3.msra.mxu0 %v295_v33  ;;  %661 = vmatpush3.msra.mxu1 %v381_v34 }
  0x24   : > { %627 = vmatprep.subr.mxu0 %v691_v2  ;;  %662 = vmatprep.subr.mxu1 %v691_v2 }
  0x25   : > { %628 = vmatpush3.msra.mxu0 %v294_v35  ;;  %663 = vmatpush3.msra.mxu1 %v380_v36 }
  0x26   : > { %629 = vmatprep.subr.mxu0 %v691_v2  ;;  %664 = vmatprep.subr.mxu1 %v691_v2 }
  0x27   : > { %630 = vmatpush3.msra.mxu0 %v293_v37  ;;  %665 = vmatpush3.msra.mxu1 %v379_v38 }
  0x28   : > { %631 = vmatprep.subr.mxu0 %v691_v2  ;;  %666 = vmatprep.subr.mxu1 %v691_v2 }
  0x29   : > { %632 = vmatpush3.msra.mxu0 %v292_v39  ;;  %667 = vmatpush3.msra.mxu1 %v378_v40 }
  0x2a   : > { %633 = vmatprep.subr.mxu0 %v691_v2  ;;  %668 = vmatprep.subr.mxu1 %v691_v2 }
  0x2b   : > { %634 = vmatpush3.msra.mxu0 %v291_v43  ;;  %635 = vmatprep.mubr.msk.f32.mxu0 %vm692_vm0, %v691_v2 }
  0x2c   : > { %669 = vmatpush3.msra.mxu1 %v377_v44  ;;  %670 = vmatprep.mubr.msk.f32.mxu1 %vm692_vm0, %v691_v2 }
  0x2d   : > { %636 = vmatmul.mubr.f32.vlgmr.msra.gmra.mxu0 %v290_v45  ;;  %671 = vmatmul.mubr.f32.vlgmr.msra.gmra.mxu1 %v290_v45 }
  0xed   : > { %v373_v46 = vpop.f32.mrf.mxu0  ;;  %v459_v47 = vpop.f32.mrf.mxu1 }
  0xee   : > { %v463_v48 = vmax.f32 %v373_v46, %v459_v47 }
  0xef   : > { %v637_v49 = vpop.f32.mrf.mxu0  ;;  %v672_v50 = vpop.f32.mrf.mxu1 }
  0xf0   : > { %465 = vst.msk [vmem:[%s262_s12] sm:$0xff] %vm464_vm1, %v463_v48 }
  0xf1 PF: > { %s17_s21 = sadd.s32 1, %s689_s21  }
  0xf2   : > { %p14_p4 = scmp.ge.s32.totalorder %s17_s21, 4  }
  0xf4   :  { %16 = sbr.rel (!%p14_p4) target bundleno = 1 (0x1), region = 83 }

// kernel: encoder_block_forward.4
= control target key start
LH: loop header
LB: loop body
LE: loop exit
PB: predicated region body
PF: predicated region fallthrough
CT: control target
= control target key end

     0   :  { %s1216_s21 = smov 0   ;;  %s1442_s0 = inlined_call_operand.vmem [shape: f32[2,16,128], index: 0, kind: input, shape index: {}]   ;;  %s1443_s1 = inlined_call_operand.vmem [shape: f32[1,128], index: 1, kind: input, shape index: {}]   ;;  %s1444_s2 = inlined_call_operand.vmem [shape: f32[1,128], index: 2, kind: input, shape index: {}]   ;;  %s1445_s3 = inlined_call_operand.vmem [shape: f32[3,128,128], index: 3, kind: input, shape index: {}]   ;;  %s1446_s4 = inlined_call_operand.vmem [shape: f32[128,8], index: 4, kind: input, shape index: {}]   ;;  %s1447_s5 = inlined_call_operand.vmem [shape: f32[2,16,128], index: 5, kind: output, shape index: {0}]   ;;  %s1448_s6 = inlined_call_operand.vmem [shape: f32[2,2,8], index: 6, kind: output, shape index: {1}]  }
   0x1 LB: > { %s850_s22 = sadd.s32 4294967295, %s1178_s21   ;;  %p854_p0 = scmp.ge.s32.totalorder %s1178_s21, 1  ;;  %s1178_s21 = sphi %s1216_s21, %s17_s21  }
   0x2   : > { %p215_p1 = scmp.lt.s32.totalorder %s1178_s21, 3 }
   0x4   : > { %p216_p2 = pnand %p854_p0, %p215_p1 }
   0x5   : > { %p249_p3 = scmp.lt.s32.totalorder (!%p216_p2), %s850_s22, 1 }
   0x6   : > { %219 = sbr.rel (%p216_p2) target bundleno = 489 (0x1e9), region = 40 }
   0xb   : > { %v877_v0 = vld [vmem:[%s1445_s3 + $0xf8] sm:$0xff]  ;;  %v876_v2 = vld [vmem:[%s1445_s3 + $0xf0] sm:$0xff]  ;;  %v1180_v4 = vmov 0.0   ;;  %v875_v5 = vld [vmem:[%s1445_s3 + $0xe8] sm:$0xff]  ;;  %s1450_s22 = smov (!%p249_p3, %s850_s22), 1  ;;  %vm742_vm0 = vcmask 64512  }
   0xc   : > { %v306_v1 = vld [vmem:[%s1445_s3 + $0x78] sm:$0xff]  ;;  %988 = vmatprep.subr.mxu0 %v877_v0  ;;  %v305_v3 = vld [vmem:[%s1445_s3 + $0x70] sm:$0xff]  ;;  %285 = vst [vmem:[#allocation2] sm:$0x1] %v1180_v4  ;;  %286 = vst [vmem:[#allocation2 + $0x11] sm:$0x1] %v1180_v4 }
   0xd   : > { %1023 = vmatprep.subr.mxu1 %v306_v1  ;;  %989 = vmatpush3.msra.mxu0 %v877_v0  ;;  %v304_v6 = vld [vmem:[%s1445_s3 + $0x68] sm:$0xff]  ;;  %v874_v7 = vld [vmem:[%s1445_s3 + $0xe0] sm:$0xff]  ;;  %s896_s15 = sshll.u32 %s1450_s22, 4  ;;  %v873_v9 = vld [vmem:[%s1445_s3 + $0xd8] sm:$0xff]  ;;  %vm752_vm1 = vcmask 57344  }
   0xe   : > { %1024 = vmatpush3.msra.mxu1 %v306_v1  ;;  %990 = vmatprep.subr.mxu0 %v876_v2  ;;  %v303_v8 = vld [vmem:[%s1445_s3 + $0x60] sm:$0xff]  ;;  %v302_v10 = vld [vmem:[%s1445_s3 + $0x58] sm:$0xff]  ;;  %s253_s24 = scalar_lea.vmem %s1442_s0, %s896_s15  ;;  %v872_v11 = vld [vmem:[%s1445_s3 + $0xd0] sm:$0xff]  ;;  %s258_s10 = scalar_lea.vmem %s1447_s5, %s896_s15 }
   0xf   : > { %1025 = vmatprep.subr.mxu1 %v305_v3  ;;  %991 = vmatpush3.msra.mxu0 %v876_v2  ;;  %v301_v12 = vld [vmem:[%s1445_s3 + $0x50] sm:$0xff]  ;;  %v871_v13 = vld [vmem:[%s1445_s3 + $0xc8] sm:$0xff]  ;;  %v263_v15 = vld [vmem:[%s253_s24] sm:$0xff]  ;;  %s859_s15 = sshll.u32 %s1450_s22, 1 }
  0x10   : > { %1026 = vmatpush3.msra.mxu1 %v305_v3  ;;  %992 = vmatprep.subr.mxu0 %v875_v5  ;;  %v300_v14 = vld [vmem:[%s1445_s3 + $0x48] sm:$0xff]  ;;  %v860_v16 = vld [vmem:[%s1443_s1] ss:$0 sm:$0xff]  ;;  %v869_v23 = vld [vmem:[%s1445_s3 + $0xb8] sm:$0xff]  ;;  %s262_s13 = scalar_lea.vmem %s1448_s6, %s859_s15 }
  0x11   : > { %1027 = vmatprep.subr.mxu1 %v304_v6  ;;  %993 = vmatpush3.msra.mxu0 %v875_v5  ;;  %v861_v17 = vld [vmem:[%s1444_s2] ss:$0 sm:$0xff]  ;;  %v264_v18 = vld [vmem:[%s253_s24 + $0x8] sm:$0xff]  ;;  %v272_v21 = vmul.f32 %v860_v16, %v263_v15  ;;  %v298_v24 = vld [vmem:[%s1445_s3 + $0x38] sm:$0xff] }
  0x12   : > { %1028 = vmatpush3.msra.mxu1 %v304_v6  ;;  %994 = vmatprep.subr.mxu0 %v874_v7  ;;  %v870_v19 = vld [vmem:[%s1445_s3 + $0xc0] sm:$0xff]  ;;  %v273_v22 = vmul.f32 %v860_v16, %v264_v18  ;;  %v868_v27 = vld [vmem:[%s1445_s3 + $0xb0] sm:$0xff]  ;;  %v867_v31 = vld [vmem:[%s1445_s3 + $0xa8] sm:$0xff] }
  0x13   : > { %1029 = vmatprep.subr.mxu1 %v303_v8  ;;  %995 = vmatpush3.msra.mxu0 %v874_v7  ;;  %v299_v20 = vld [vmem:[%s1445_s3 + $0x40] sm:$0xff]  ;;  %v281_v25 = vadd.f32 %v861_v17, %v272_v21  ;;  %v297_v28 = vld [vmem:[%s1445_s3 + $0x30] sm:$0xff]  ;;  %v296_v32 = vld [vmem:[%s1445_s3 + $0x28] sm:$0xff] }
  0x14   : > { %1030 = vmatpush3.msra.mxu1 %v303_v8  ;;  %996 = vmatprep.subr.mxu0 %v873_v9  ;;  %v282_v26 = vadd.f32 %v861_v17, %v273_v22  ;;  %v866_v33 = vld [vmem:[%s1445_s3 + $0xa0] sm:$0xff]  ;;  %v865_v35 = vld [vmem:[%s1445_s3 + $0x98] sm:$0xff]  ;;  %v864_v37 = vld [vmem:[%s1445_s3 + $0x90] sm:$0xff] }
  0x15   : > { %1031 = vmatprep.subr.mxu1 %v302_v10  ;;  %997 = vmatpush3.msra.mxu0 %v873_v9  ;;  %v283_v29 = vmax.f32 %v281_v25, 0.0  ;;  %v295_v34 = vld [vmem:[%s1445_s3 + $0x20] sm:$0xff]  ;;  %v294_v36 = vld [vmem:[%s1445_s3 + $0x18] sm:$0xff]  ;;  %v293_v38 = vld [vmem:[%s1445_s3 + $0x10] sm:$0xff] }
  0x16   : > { %1032 = vmatpush3.msra.mxu1 %v302_v10  ;;  %998 = vmatprep.subr.mxu0 %v872_v11  ;;  %v284_v30 = vmax.f32 %v282_v26, 0.0  ;;  %v863_v39 = vld [vmem:[%s1445_s3 + $0x88] sm:$0xff]  ;;  %v862_v41 = vld [vmem:[%s1445_s3 + $0x80] sm:$0xff]  ;;  %v893_v45 = vld [vmem:[%s1445_s3 + $0x178] sm:$0xff] }
  0x17   : > { %1033 = vmatprep.subr.mxu1 %v301_v12  ;;  %999 = vmatpush3.msra.mxu0 %v872_v11  ;;  %287 = vst [vmem:[#allocation2 + $0x1] sm:$0xff] %v283_v29  ;;  %v292_v40 = vld [vmem:[%s1445_s3 + $0x8] sm:$0xff]  ;;  %v291_v42 = vld [vmem:[%s1445_s3] sm:$0xff]  ;;  %v892_v47 = vld [vmem:[%s1445_s3 + $0x170] sm:$0xff] }
  0x18   : > { %1034 = vmatpush3.msra.mxu1 %v301_v12  ;;  %1000 = vmatprep.subr.mxu0 %v871_v13  ;;  %288 = vst [vmem:[#allocation2 + $0x9] sm:$0xff] %v284_v30  ;;  %v891_v48 = vld [vmem:[%s1445_s3 + $0x168] sm:$0xff]  ;;  %v890_v49 = vld [vmem:[%s1445_s3 + $0x160] sm:$0xff]  ;;  %v889_v50 = vld [vmem:[%s1445_s3 + $0x158] sm:$0xff] }
  0x19   : > { %1035 = vmatprep.subr.mxu1 %v300_v14  ;;  %1001 = vmatpush3.msra.mxu0 %v871_v13  ;;  %v888_v51 = vld [vmem:[%s1445_s3 + $0x150] sm:$0xff]  ;;  %v887_v52 = vld [vmem:[%s1445_s3 + $0x148] sm:$0xff]  ;;  %v886_v53 = vld [vmem:[%s1445_s3 + $0x140] sm:$0xff] }
  0x1a   : > { %1036 = vmatpush3.msra.mxu1 %v300_v14  ;;  %1002 = vmatprep.subr.mxu0 %v870_v19  ;;  %v885_v54 = vld [vmem:[%s1445_s3 + $0x138] sm:$0xff]  ;;  %v884_v55 = vld [vmem:[%s1445_s3 + $0x130] sm:$0xff]  ;;  %v883_v56 = vld [vmem:[%s1445_s3 + $0x128] sm:$0xff] }
  0x1b   : > { %1037 = vmatprep.subr.mxu1 %v299_v20  ;;  %1003 = vmatpush3.msra.mxu0 %v870_v19  ;;  %v882_v57 = vld [vmem:[%s1445_s3 + $0x120] sm:$0xff]  ;;  %v881_v58 = vld [vmem:[%s1445_s3 + $0x118] sm:$0xff]  ;;  %v880_v59 = vld [vmem:[%s1445_s3 + $0x110] sm:$0xff] }
  0x1c   : > { %1038 = vmatpush3.msra.mxu1 %v299_v20  ;;  %1004 = vmatprep.subr.mxu0 %v869_v23  ;;  %v879_v60 = vld [vmem:[%s1445_s3 + $0x108] sm:$0xff]  ;;  %v878_v61 = vld [vmem:[%s1445_s3 + $0x100] sm:$0xff]  ;;  %v589_v63 = vld [vmem:[%s1446_s4 + $0x78] sm:$0xff] }
  0x1d   : > { %1039 = vmatprep.subr.mxu1 %v298_v24  ;;  %1005 = vmatpush3.msra.mxu0 %v869_v23  ;;  %v588_v0 = vld [vmem:[%s1446_s4 + $0x70] sm:$0xff]  ;;  %v587_v1 = vld [vmem:[%s1446_s4 + $0x68] sm:$0xff]  ;;  %v586_v2 = vld [vmem:[%s1446_s4 + $0x60] sm:$0xff] }
  0x1e   : > { %1040 = vmatpush3.msra.mxu1 %v298_v24  ;;  %1006 = vmatprep.subr.mxu0 %v868_v27  ;;  %v289_v43 = vld [vmem:[#allocation2] sm:$0xff]  ;;  %v585_v3 = vld [vmem:[%s1446_s4 + $0x58] sm:$0xff]  ;;  %v584_v4 = vld [vmem:[%s1446_s4 + $0x50] sm:$0xff] }
  0x1f   : > { %1041 = vmatprep.subr.mxu1 %v297_v28  ;;  %1007 = vmatpush3.msra.mxu0 %v868_v27  ;;  %v290_v44 = vld [vmem:[#allocation2 + $0x8] sm:$0xff]  ;;  %v582_v6 = vld [vmem:[%s1446_s4 + $0x40] sm:$0xff]  ;;  %v581_v7 = vld [vmem:[%s1446_s4 + $0x38] sm:$0xff] }
  0x20   : > { %1042 = vmatpush3.msra.mxu1 %v297_v28  ;;  %1008 = vmatprep.subr.mxu0 %v867_v31  ;;  %v476_v46 = vld [vmem:[#allocation2 + $0x2] sm:$0xff]  ;;  %v477_v62 = vld [vmem:[#allocation2 + $0xa] sm:$0xff]  ;;  %v577_v11 = vld [vmem:[%s1446_s4 + $0x18] sm:$0xff] }
  0x21   : > { %1043 = vmatprep.subr.mxu1 %v296_v32  ;;  %1009 = vmatpush3.msra.mxu0 %v867_v31  ;;  %v583_v5 = vld [vmem:[%s1446_s4 + $0x48] sm:$0xff]  ;;  %v580_v8 = vld [vmem:[%s1446_s4 + $0x30] sm:$0xff]  ;;  %v578_v10 = vld [vmem:[%s1446_s4 + $0x20] sm:$0xff] }
  0x22   : > { %1044 = vmatpush3.msra.mxu1 %v296_v32  ;;  %1010 = vmatprep.subr.mxu0 %v866_v33  ;;  %v579_v9 = vld [vmem:[%s1446_s4 + $0x28] sm:$0xff]  ;;  %v576_v12 = vld [vmem:[%s1446_s4 + $0x10] sm:$0xff]  ;;  %v574_v14 = vld [vmem:[%s1446_s4] sm:$0xff] }
  0x23   : > { %1045 = vmatprep.subr.mxu1 %v295_v34  ;;  %1011 = vmatpush3.msra.mxu0 %v866_v33  ;;  %v575_v13 = vld [vmem:[%s1446_s4 + $0x8] sm:$0xff] }
  0x24   : > { %1046 = vmatpush3.msra.mxu1 %v295_v34  ;;  %1012 = vmatprep.subr.mxu0 %v865_v35 }
  0x25   : > { %1047 = vmatprep.subr.mxu1 %v294_v36  ;;  %1013 = vmatpush3.msra.mxu0 %v865_v35 }
  0x26   : > { %1048 = vmatpush3.msra.mxu1 %v294_v36  ;;  %1014 = vmatprep.subr.mxu0 %v864_v37 }
  0x27   : > { %1049 = vmatprep.subr.mxu1 %v293_v38  ;;  %1015 = vmatpush3.msra.mxu0 %v864_v37 }
  0x28   : > { %1050 = vmatpush3.msra.mxu1 %v293_v38  ;;  %1016 = vmatprep.subr.mxu0 %v863_v39 }
  0x29   : > { %1051 = vmatprep.subr.mxu1 %v292_v40  ;;  %1017 = vmatpush3.msra.mxu0 %v863_v39 }
  0x2a   : > { %1052 = vmatpush3.msra.mxu1 %v292_v40  ;;  %1018 = vmatprep.subr.mxu0 %v862_v41 }
  0x2b   : > { %1053 = vmatprep.subr.mxu1 %v291_v42  ;;  %1019 = vmatpush3.msra.mxu0 %v862_v41 }
  0x2c   : > { %1020 = vmatprep.mubr.f32.mxu0 %v283_v29  ;;  %1054 = vmatpush3.msra.mxu1 %v291_v42 }
  0x2d   : > { %1055 = vmatprep.mubr.f32.mxu1 %v289_v43  ;;  %1021 = vmatmul.mubr.f32.vlgmr.msra.gmra.mxu0 %v284_v30 }
  0x2e   : > { %1056 = vmatmul.mubr.f32.vlgmr.msra.gmra.mxu1 %v290_v44  ;;  %1058 = vmatprep.subr.mxu0 %v893_v45 }
  0x2f   : > { %1090 = vmatprep.mubr.f32.mxu0 %v476_v46  ;;  %1059 = vmatpush3.msra.mxu0 %v893_v45 }
  0x30   : > { %1060 = vmatprep.subr.mxu0 %v892_v47  ;;  %1093 = vmatprep.subr.mxu1 %v589_v63 }
  0x31   : > { %1061 = vmatpush3.msra.mxu0 %v892_v47  ;;  %1094 = vmatpush3.msra.mxu1 %v589_v63 }
  0x32   : > { %1062 = vmatprep.subr.mxu0 %v891_v48  ;;  %1095 = vmatprep.subr.mxu1 %v588_v0 }
  0x33   : > { %1063 = vmatpush3.msra.mxu0 %v891_v48  ;;  %1096 = vmatpush3.msra.mxu1 %v588_v0 }
  0x34   : > { %1064 = vmatprep.subr.mxu0 %v890_v49  ;;  %1097 = vmatprep.subr.mxu1 %v587_v1 }
  0x35   : > { %1065 = vmatpush3.msra.mxu0 %v890_v49  ;;  %1098 = vmatpush3.msra.mxu1 %v587_v1 }
  0x36   : > { %1066 = vmatprep.subr.mxu0 %v889_v50  ;;  %1099 = vmatprep.subr.mxu1 %v586_v2 }
  0x37   : > { %1067 = vmatpush3.msra.mxu0 %v889_v50  ;;  %1100 = vmatpush3.msra.mxu1 %v586_v2 }
  0x38   : > { %1068 = vmatprep.subr.mxu0 %v888_v51  ;;  %1101 = vmatprep.subr.mxu1 %v585_v3 }
  0x39   : > { %1069 = vmatpush3.msra.mxu0 %v888_v51  ;;  %1102 = vmatpush3.msra.mxu1 %v585_v3 }
  0x3a   : > { %1070 = vmatprep.subr.mxu0 %v887_v52  ;;  %1103 = vmatprep.subr.mxu1 %v584_v4 }
  0x3b   : > { %1071 = vmatpush3.msra.mxu0 %v887_v52  ;;  %1104 = vmatpush3.msra.mxu1 %v584_v4 }
  0x3c   : > { %1072 = vmatprep.subr.mxu0 %v886_v53  ;;  %1105 = vmatprep.subr.mxu1 %v583_v5 }
  0x3d   : > { %1073 = vmatpush3.msra.mxu0 %v886_v53  ;;  %1106 = vmatpush3.msra.mxu1 %v583_v5 }
  0x3e   : > { %1074 = vmatprep.subr.mxu0 %v885_v54  ;;  %1107 = vmatprep.subr.mxu1 %v582_v6 }
  0x3f   : > { %1075 = vmatpush3.msra.mxu0 %v885_v54  ;;  %1108 = vmatpush3.msra.mxu1 %v582_v6 }
  0x40   : > { %1076 = vmatprep.subr.mxu0 %v884_v55  ;;  %1109 = vmatprep.subr.mxu1 %v581_v7 }
  0x41   : > { %1077 = vmatpush3.msra.mxu0 %v884_v55  ;;  %1110 = vmatpush3.msra.mxu1 %v581_v7 }
  0x42   : > { %1078 = vmatprep.subr.mxu0 %v883_v56  ;;  %1111 = vmatprep.subr.mxu1 %v580_v8 }
  0x43   : > { %1079 = vmatpush3.msra.mxu0 %v883_v56  ;;  %1112 = vmatpush3.msra.mxu1 %v580_v8 }
  0x44   : > { %1080 = vmatprep.subr.mxu0 %v882_v57  ;;  %1113 = vmatprep.subr.mxu1 %v579_v9 }
  0x45   : > { %1081 = vmatpush3.msra.mxu0 %v882_v57  ;;  %1114 = vmatpush3.msra.mxu1 %v579_v9 }
  0x46   : > { %1082 = vmatprep.subr.mxu0 %v881_v58  ;;  %1115 = vmatprep.subr.mxu1 %v578_v10 }
  0x47   : > { %1083 = vmatpush3.msra.mxu0 %v881_v58  ;;  %1116 = vmatpush3.msra.mxu1 %v578_v10 }
  0x48   : > { %1084 = vmatprep.subr.mxu0 %v880_v59  ;;  %1117 = vmatprep.subr.mxu1 %v577_v11 }
  0x49   : > { %1085 = vmatpush3.msra.mxu0 %v880_v59  ;;  %1118 = vmatpush3.msra.mxu1 %v577_v11 }
  0x4a   : > { %1086 = vmatprep.subr.mxu0 %v879_v60  ;;  %1119 = vmatprep.subr.mxu1 %v576_v12 }
  0x4b   : > { %1087 = vmatpush3.msra.mxu0 %v879_v60  ;;  %1120 = vmatpush3.msra.mxu1 %v576_v12 }
  0x4c   : > { %1088 = vmatprep.subr.mxu0 %v878_v61  ;;  %1121 = vmatprep.subr.mxu1 %v575_v13 }
  0x4d   : > { %1089 = vmatpush3.msra.mxu0 %v878_v61  ;;  %1122 = vmatpush3.msra.mxu1 %v575_v13 }
  0x4e   : > { %1091 = vmatmul.mubr.f32.vlgmr.msra.gmra.mxu0 %v477_v62  ;;  %1128 = vmatprep.subr.mxu0 %v589_v63 }
  0x4f   : > { %1129 = vmatpush3.msra.mxu0 %v589_v63  ;;  %1123 = vmatprep.subr.mxu1 %v574_v14 }
  0x50   : > { %1130 = vmatprep.subr.mxu0 %v588_v0  ;;  %1124 = vmatpush3.msra.mxu1 %v574_v14 }
  0x51   : > { %1131 = vmatpush3.msra.mxu0 %v588_v0 }
  0x52   : > { %1132 = vmatprep.subr.mxu0 %v587_v1 }
  0x53   : > { %1133 = vmatpush3.msra.mxu0 %v587_v1 }
  0x54   : > { %1134 = vmatprep.subr.mxu0 %v586_v2 }
  0x55   : > { %1135 = vmatpush3.msra.mxu0 %v586_v2 }
  0x56   : > { %1136 = vmatprep.subr.mxu0 %v585_v3 }
  0x57   : > { %1137 = vmatpush3.msra.mxu0 %v585_v3 }
  0x58   : > { %1138 = vmatprep.subr.mxu0 %v584_v4 }
  0x59   : > { %1139 = vmatpush3.msra.mxu0 %v584_v4 }
  0x5a   : > { %1140 = vmatprep.subr.mxu0 %v583_v5 }
  0x5b   : > { %1141 = vmatpush3.msra.mxu0 %v583_v5 }
  0x5c   : > { %1142 = vmatprep.subr.mxu0 %v582_v6 }
  0x5d   : > { %1143 = vmatpush3.msra.mxu0 %v582_v6 }
  0x5e   : > { %1144 = vmatprep.subr.mxu0 %v581_v7 }
  0x5f   : > { %1145 = vmatpush3.msra.mxu0 %v581_v7 }
  0x60   : > { %1146 = vmatprep.subr.mxu0 %v580_v8 }
  0x61   : > { %1147 = vmatpush3.msra.mxu0 %v580_v8 }
  0x62   : > { %1148 = vmatprep.subr.mxu0 %v579_v9 }
  0x63   : > { %1149 = vmatpush3.msra.mxu0 %v579_v9 }
  0x64   : > { %1150 = vmatprep.subr.mxu0 %v578_v10 }
  0x65   : > { %1151 = vmatpush3.msra.mxu0 %v578_v10 }
  0x66   : > { %1152 = vmatprep.subr.mxu0 %v577_v11 }
  0x67   : > { %1153 = vmatpush3.msra.mxu0 %v577_v11 }
  0x68   : > { %1154 = vmatprep.subr.mxu0 %v576_v12 }
  0x69   : > { %1155 = vmatpush3.msra.mxu0 %v576_v12 }
  0x6a   : > { %1156 = vmatprep.subr.mxu0 %v575_v13 }
  0x6b   : > { %1157 = vmatpush3.msra.mxu0 %v575_v13 }
  0x6c   : > { %1158 = vmatprep.subr.mxu0 %v574_v14 }
  0x6d   : > { %1159 = vmatpush3.msra.mxu0 %v574_v14 }
  0xed   : > { %v1022_v15 = vpop.f32.mrf.mxu0 }
  0xee   : > { %v1057_v16 = vpop.f32.mrf.mxu1 }
  0xef   : > { %v392_v17 = vpop.f32.mrf.mxu0  ;;  %v473_v19 = vadd.f32 %v1057_v16, %v1022_v15 }
  0xf0   : > { %v467_v18 = vpop.f32.mrf.mxu1 }
  0xf1   : > { %v468_v21 = vadd.f32 %v467_v18, %v392_v17 }
 0x10e   : > { %v1092_v20 = vpop.f32.mrf.mxu0 }
 0x10f   : > { %v571_v22 = vadd.f32 %v1092_v20, %v473_v19 }
 0x110   : > { %v561_v23 = vpop.f32.mrf.mxu0 }
 0x111   : > { %573 = vst [vmem:[%s258_s10 + $0x8] sm:$0xff] %v571_v22  ;;  %v570_v24 = vadd.f32 %v561_v23, %v468_v21  ;;  %v666_v26 = vmul.f32 %v571_v22, %v571_v22 }
 0x113   : > { %572 = vst [vmem:[%s258_s10] sm:$0xff] %v570_v24  ;;  %1125 = vmatprep.mubr.f32.mxu1 %v570_v24  ;;  %v665_v25 = vmul.f32 %v570_v24, %v570_v24 }
 0x114   : > { %1126 = vmatmul.mubr.f32.vlgmr.msra.gmra.mxu1 %v571_v22 }
 0x115   : > { %1160 = vmatprep.mubr.f32.mxu0 %v665_v25 }
 0x116   : > { %1161 = vmatmul.mubr.f32.vlgmr.msra.gmra.mxu0 %v666_v26 }
 0x1d4   : > { %v1127_v27 = vpop.f32.mrf.mxu1 }
 0x1d5   : > { %v744_v30 = vsel %vm742_vm0, %v1127_v27, 0.0 }
 0x1d6   : > { %v656_v28 = vpop.f32.mrf.mxu1  ;;  %v1162_v29 = vpop.f32.mrf.mxu0 }
 0x1d7   : > { %v743_v31 = vsel %vm742_vm0, %v656_v28, 0.0  ;;  %v755_v34 = vsel %vm742_vm0, %v1162_v29, 0.0 }
 0x1d8   : > { %v745_v32 = vadd.f32 %v744_v30, %v743_v31  ;;  %v733_v33 = vpop.f32.mrf.mxu0 }
 0x1d9   : > { %v754_v35 = vsel %vm742_vm0, %v733_v33, 0.0 }
 0x1da   : > { %v746_v36 = vrot.slane %v745_v32, 4  ;;  %v756_v37 = vadd.f32 %v755_v34, %v754_v35 }
 0x1dc   : > { %v747_v38 = vadd.f32 %v746_v36, %v745_v32  ;;  %v757_v39 = vrot.slane %v756_v37, 4 }
 0x1de   : > { %v748_v40 = vrot.slane %v747_v38, 2  ;;  %v758_v41 = vadd.f32 %v757_v39, %v756_v37 }
 0x1e0   : > { %v749_v42 = vadd.f32 %v748_v40, %v747_v38  ;;  %v759_v43 = vrot.slane %v758_v41, 2 }
 0x1e2   : > { %v750_v44 = vrot.slane %v749_v42, 1  ;;  %v760_v45 = vadd.f32 %v759_v43, %v758_v41 }
 0x1e4   : > { %v751_v46 = vadd.f32 %v750_v44, %v749_v42  ;;  %v761_v47 = vrot.slane %v760_v45, 1 }
 0x1e6   : > { %753 = vst.msk [vmem:[%s262_s13] sm:$0x1] %vm752_vm1, %v751_v46  ;;  %v762_v48 = vadd.f32 %v761_v47, %v760_v45 }
 0x1e8   : > { %763 = vst.msk [vmem:[%s262_s13 + $0x1] sm:$0x1] %vm752_vm1, %v762_v48 }
 0x1e9 PF: > { %s17_s21 = sadd.s32 1, %s1178_s21  }
 0x1ea   : > { %p14_p4 = scmp.ge.s32.totalorder %s17_s21, 4  }
 0x1ec   :  { %16 = sbr.rel (!%p14_p4) target bundleno = 1 (0x1), region = 84 }

</bundles_post_ra>
